<compile_context>
chip_gen: v5e
topology: v5e:2x2
jax: 0.10.0
libtpu: 0.0.40
codegen_flags: <defaults>
</compile_context>

<pallas_src>
import functools
import math

import jax
import jax.numpy as jnp
from jax.experimental import pallas as pl
from jax.experimental.pallas import tpu as pltpu


# --------------------------------------------------------------------------- #
# Kernel
# --------------------------------------------------------------------------- #
def ltm_kernel(x_ref, w1_ref, w2_ref, b1_ref, b2_ref, o_ref):
    """One (batch, spatial-tile) block per grid step.

    x_ref : (T*C, S)       input slab in the natural HBM layout (t major, c minor
                           on sublanes; spatial tile on lanes)
    w1_ref: (T*P4p, T*C)   block-banded conv1 weight (BN1 scale folded)
    w2_ref: (T*C, T*P4p)   block-banded conv2 weight (dilation 2, BN2 folded)
    b1_ref: (T*P4p, 1)     BN1 bias, tiled over time
    b2_ref: (T*C, 1)       BN2 bias, tiled over time
    o_ref : (T*C, S)       output slab  x * sigmoid(gate)
    """
    cdt = w1_ref.dtype                                  # matmul compute dtype

    # conv1 (k=3, pad=1, dil=1) + bn1(folded) + relu  -- one banded matmul
    x = x_ref[...].astype(cdt)
    h = jnp.dot(w1_ref[...], x, preferred_element_type=jnp.float32)
    h = jnp.maximum(h + b1_ref[...], 0.0).astype(cdt)

    # conv2 (k=3, pad=2, dil=2) + bn2(folded)         -- one banded matmul
    y = jnp.dot(w2_ref[...], h, preferred_element_type=jnp.float32)
    y = y + b2_ref[...]

    # sigmoid gate: exp rides the EUP slot.  approx=False keeps the 1e-4 f32
    # check; production would use pl.reciprocal(..., approx=True) (also EUP).
    gate = pl.reciprocal(1.0 + jnp.exp(-y), approx=False)

    # re-read x at the store (no extra full slab live across both matmuls);
    # single unmasked, lane-dense full-tile store.
    o_ref[...] = (x_ref[...] * gate).astype(o_ref.dtype)


# --------------------------------------------------------------------------- #
# Wrapper helpers
# --------------------------------------------------------------------------- #
def _band_weight(w_taps, num_segments, dilation):
    """w_taps: (3, O, Cin) tap-major -> (T*O, T*Cin) block-banded matrix.

    Row (t_out, o), col (t_in, c) holds W_tap[k][o, c] where
    t_in = t_out + (k-1)*dilation; out-of-range taps stay zero, which encodes
    the temporal zero padding of the PyTorch Conv3d.
    """
    T = num_segments
    _, O, Cin = w_taps.shape
    Wb = jnp.zeros((T, O, T, Cin), w_taps.dtype)
    for k in range(3):
        off = (k - 1) * dilation
        for t in range(T):
            tin = t + off
            if 0 <= tin < T:
                Wb = Wb.at[t, :, tin, :].set(w_taps[k])
    return Wb.reshape(T * O, T * Cin)


def _pick_hw_tile(hw_pad, batch, tc, itemsize, vmem_bytes):
    """Largest multiple-of-128 divisor of hw_pad that (a) keeps the x block
    within ~1/64 of physical VMEM and (b) still yields >= 8 grid steps for the
    megacore / DMA pipeline; otherwise the smallest fitting tile."""
    m = hw_pad // 128
    cands = [128 * k for k in range(m, 0, -1) if m % k == 0]   # largest first
    block_budget = max(256 << 10, vmem_bytes // 64)
    fitting = [d for d in cands if tc * d * itemsize <= block_budget]
    if not fitting:
        fitting = [cands[-1]]            # smallest (=128); vmem_limit covers it
    min_steps = 8
    for d in fitting:
        if batch * (hw_pad // d) >= min_steps:
            return d
    return fitting[-1]                   # can't reach min_steps: maximize steps


# --------------------------------------------------------------------------- #
# Public entry point
# --------------------------------------------------------------------------- #
def local_temporal_module(x, w1, w2, s1, b1, s2, b2, *, num_segments=8,
                          hw_tile=None, compute_dtype=jnp.float32):
    """x: (B*T, C, H, W) float32 (NCHW, like the PyTorch module).

    w1: (3, P//4, C) tap-major conv1 weight, w2: (3, P, P//4) tap-major conv2
    weight, s*/b*: per-channel eval-mode BatchNorm scale / bias (1-D).
    """
    bn, c, h, w = x.shape
    T = num_segments
    B = bn // T
    HW = h * w
    p4 = w1.shape[1]
    p = w2.shape[1]
    # The gate multiply x * y requires planes == inplanes.
    assert p == c, "LocalTemporalModule gate requires planes == inplanes"

    # ---- fold eval-mode BN scales into the conv weights (wrapper-side) ----
    w1f = w1 * s1.reshape(1, p4, 1)
    w2f = w2 * s2.reshape(1, p, 1)
    # pad hidden channels up to a sublane multiple (zero rows stay exactly
    # zero through relu and the matching conv2 columns are zero).
    p4p = max(8, ((p4 + 7) // 8) * 8)
    if p4p != p4:
        w1f = jnp.pad(w1f, ((0, 0), (0, p4p - p4), (0, 0)))
        w2f = jnp.pad(w2f, ((0, 0), (0, 0), (0, p4p - p4)))
        b1p = jnp.pad(b1, (0, p4p - p4))
    else:
        b1p = b1

    # block-banded weights: each temporal conv becomes ONE matmul over T*C.
    w1b = _band_weight(w1f, T, 1).astype(compute_dtype)        # (T*p4p, T*C)
    w2b = _band_weight(w2f, T, 2).astype(compute_dtype)        # (T*C, T*p4p)
    b1b = jnp.tile(b1p, T).reshape(T * p4p, 1).astype(jnp.float32)
    b2b = jnp.tile(b2, T).reshape(T * p, 1).astype(jnp.float32)

    # ---- natural layout: (B*T, C, H, W) -> (B, T*C, HW) is a FREE reshape ----
    tc = T * c
    xr = x.reshape(B, tc, HW)
    hw_pad = ((HW + 127) // 128) * 128
    if hw_pad != HW:
        # costs one extra copy, but keeps every store lane-dense / unmasked and
        # the block inside the VMEM budget; temporal convs never mix columns,
        # so the padded columns are numerically inert.
        xr = jnp.pad(xr, ((0, 0), (0, 0), (0, hw_pad - HW)))

    # ---- per-generation tile / VMEM sizing ----
    try:
        vmem_bytes = int(pltpu.get_tpu_info().vmem_capacity_bytes)
    except Exception:
        vmem_bytes = 64 << 20          # v7x-safe conservative fallback
    if hw_tile is None:
        hw_tile = _pick_hw_tile(hw_pad, B, tc, x.dtype.itemsize, vmem_bytes)
    assert hw_pad % hw_tile == 0 and hw_tile % 128 == 0
    n_hw = hw_pad // hw_tile

    # scoped-VMEM limit from the actual footprint: double-buffered in/out
    # blocks + resident weights + ~4 live f32 slabs, with 2x slack.
    blk = tc * hw_tile * x.dtype.itemsize
    wts = ((w1b.size + w2b.size) * jnp.dtype(compute_dtype).itemsize
           + (b1b.size + b2b.size) * 4)
    interm = max(tc, T * p4p) * hw_tile * 4
    est = 4 * blk + wts + 4 * interm
    vmem_limit = int(min(vmem_bytes * 9 // 10, max(2 * est, 32 << 20)))

    out = pl.pallas_call(
        ltm_kernel,
        out_shape=jax.ShapeDtypeStruct((B, tc, hw_pad), x.dtype),
        grid=(B, n_hw),
        in_specs=[
            pl.BlockSpec((None, tc, hw_tile), lambda b, s: (b, 0, s)),
            pl.BlockSpec(w1b.shape, lambda b, s: (0, 0)),
            pl.BlockSpec(w2b.shape, lambda b, s: (0, 0)),
            pl.BlockSpec(b1b.shape, lambda b, s: (0, 0)),
            pl.BlockSpec(b2b.shape, lambda b, s: (0, 0)),
        ],
        out_specs=pl.BlockSpec((None, tc, hw_tile), lambda b, s: (b, 0, s)),
        compiler_params=pltpu.CompilerParams(
            dimension_semantics=("parallel", "parallel"),
            vmem_limit_bytes=vmem_limit),
    )(xr, w1b, w2b, b1b, b2b)

    if hw_pad != HW:
        out = out[..., :HW]
    # free reshape back to (B*T, C, H, W)
    return out.reshape(bn, c, h, w)


# --------------------------------------------------------------------------- #
# Pure-JAX reference and parameter construction
# --------------------------------------------------------------------------- #
def reference(x, w1, w2, s1, b1, s2, b2, *, num_segments=8):
    """Pure-JAX reference of the PyTorch forward (eval-mode BN)."""
    bn, c, h, w = x.shape
    T = num_segments
    B = bn // T
    xr = x.reshape(B, T, c, h, w).transpose(0, 2, 1, 3, 4)   # (B,C,T,H,W)

    def tconv(inp, wk, dilation):
        # inp: (B,Cin,T,H,W), wk: (3,Cout,Cin), pad = dilation
        pad = dilation
        xp = jnp.pad(inp, ((0, 0), (0, 0), (pad, pad), (0, 0), (0, 0)))
        out = 0.0
        for k in range(3):
            out = out + jnp.einsum('oc,bcthw->bothw', wk[k],
                                   xp[:, :, k * dilation:k * dilation + T])
        return out

    y = tconv(xr, w1, 1) * s1.reshape(1, -1, 1, 1, 1) + b1.reshape(1, -1, 1, 1, 1)
    y = jnp.maximum(y, 0.0)
    y = tconv(y, w2, 2) * s2.reshape(1, -1, 1, 1, 1) + b2.reshape(1, -1, 1, 1, 1)
    y = jax.nn.sigmoid(y)
    out = xr * y
    return out.transpose(0, 2, 1, 3, 4).reshape(bn, c, h, w)


def make_params(key, inplanes, planes):
    p4 = planes // 4
    k1, k2 = jax.random.split(key)

    # xavier_normal_ on Conv3d weight (out, in, 3, 1, 1):
    # fan_in = in*3, fan_out = out*3, std = sqrt(2/(fan_in+fan_out))
    std1 = math.sqrt(2.0 / (inplanes * 3 + p4 * 3))
    std2 = math.sqrt(2.0 / (p4 * 3 + planes * 3))
    w1_oik = jax.random.normal(k1, (p4, inplanes, 3), jnp.float32) * std1
    w2_oik = jax.random.normal(k2, (planes, p4, 3), jnp.float32) * std2
    # tap-major layout: (3, Cout, Cin)
    w1 = jnp.transpose(w1_oik, (2, 0, 1))
    w2 = jnp.transpose(w2_oik, (2, 0, 1))

    eps = 1e-5
    # folded eval-mode BN: gamma=1, beta=0, running_mean=0, running_var=1
    s1 = jnp.full((p4,), 1.0 / math.sqrt(1.0 + eps), jnp.float32)
    b1 = jnp.zeros((p4,), jnp.float32)
    s2 = jnp.full((planes,), 1.0 / math.sqrt(1.0 + eps), jnp.float32)
    b2 = jnp.zeros((planes,), jnp.float32)
    return w1, w2, s1, b1, s2, b2


if __name__ == "__main__":
    num_segments = 8
    B, C, H, W = 2, 16, 16, 16        # inplanes = planes = 16 (gate multiplies x)
    planes = C

    key = jax.random.PRNGKey(0)
    kx, kp = jax.random.split(key)
    x = jax.random.normal(kx, (B * num_segments, C, H, W), jnp.float32)
    params = make_params(kp, C, planes)

    run = jax.jit(functools.partial(local_temporal_module,
                                    num_segments=num_segments))
    out = run(x, *params)
    out = jax.block_until_ready(out)

    ref = reference(x, *params, num_segments=num_segments)
    assert out.shape == x.shape
    err = float(jnp.max(jnp.abs(out - ref)))
    assert jnp.allclose(out, ref, rtol=1e-4, atol=1e-4), err

    print("KERNEL_OK")
</pallas_src>

<mosaic_0001>
module attributes {stable_mosaic.version = 11 : i64} {
  func.func @ltm_kernel(%arg0: i32, %arg1: i32, %arg2: memref<1x128x128xf32, #tpu.memory_space<vmem>>, %arg3: memref<64x128xf32, #tpu.memory_space<vmem>>, %arg4: memref<128x64xf32, #tpu.memory_space<vmem>>, %arg5: memref<64x1xf32, #tpu.memory_space<vmem>>, %arg6: memref<128x1xf32, #tpu.memory_space<vmem>>, %arg7: memref<1x128x128xf32, #tpu.memory_space<vmem>>) attributes {dimension_semantics = [#tpu.dimension_semantics<parallel>, #tpu.dimension_semantics<parallel>], iteration_bounds = array<i64: 2, 2>, scalar_prefetch = 0 : i64, scratch_operands = 0 : i64, tpu.core_type = #tpu.core_type<tc>, window_params = [{transform_indices = @transform_0, window_bounds = array<i64: 1, 128, 128>}, {pipeline_mode = #tpu.pipeline_mode<synchronous>, transform_indices = @transform_1, window_bounds = array<i64: 64, 128>}, {pipeline_mode = #tpu.pipeline_mode<synchronous>, transform_indices = @transform_2, window_bounds = array<i64: 128, 64>}, {pipeline_mode = #tpu.pipeline_mode<synchronous>, transform_indices = @transform_3, window_bounds = array<i64: 64, 1>}, {pipeline_mode = #tpu.pipeline_mode<synchronous>, transform_indices = @transform_4, window_bounds = array<i64: 128, 1>}, {transform_indices = @transform_5, window_bounds = array<i64: 1, 128, 128>}]} {
    %c0 = arith.constant 0 : index
    %c0_0 = arith.constant 0 : index
    %c0_1 = arith.constant 0 : index
    %0 = vector.load %arg2[%c0, %c0_0, %c0_1] : memref<1x128x128xf32, #tpu.memory_space<vmem>>, vector<1x128x128xf32>
    %1 = vector.shape_cast %0 : vector<1x128x128xf32> to vector<128x128xf32>
    %c0_2 = arith.constant 0 : index
    %c0_3 = arith.constant 0 : index
    %2 = vector.load %arg3[%c0_2, %c0_3] : memref<64x128xf32, #tpu.memory_space<vmem>>, vector<64x128xf32>
    %cst = arith.constant dense<0.000000e+00> : vector<64x128xf32>
    %3 = tpu.matmul %2, %1, %cst {dimension_numbers = #tpu.dot_dimension_numbers<[1], [0], [0], [1], [0, 0, 1, 1], [], []>} : vector<64x128xf32>, vector<128x128xf32>, vector<64x128xf32> -> vector<64x128xf32>
    %c0_4 = arith.constant 0 : index
    %c0_5 = arith.constant 0 : index
    %4 = vector.load %arg5[%c0_4, %c0_5] : memref<64x1xf32, #tpu.memory_space<vmem>>, vector<64x1xf32>
    %5 = vector.broadcast %4 : vector<64x1xf32> to vector<64x128xf32>
    %6 = arith.addf %3, %5 : vector<64x128xf32>
    %cst_6 = arith.constant 0.000000e+00 : f32
    %7 = vector.broadcast %cst_6 : f32 to vector<64x128xf32>
    %8 = arith.maximumf %6, %7 : vector<64x128xf32>
    %c0_7 = arith.constant 0 : index
    %c0_8 = arith.constant 0 : index
    %9 = vector.load %arg4[%c0_7, %c0_8] : memref<128x64xf32, #tpu.memory_space<vmem>>, vector<128x64xf32>
    %cst_9 = arith.constant dense<0.000000e+00> : vector<128x128xf32>
    %10 = tpu.matmul %9, %8, %cst_9 {dimension_numbers = #tpu.dot_dimension_numbers<[1], [0], [0], [1], [0, 0, 1, 1], [], []>} : vector<128x64xf32>, vector<64x128xf32>, vector<128x128xf32> -> vector<128x128xf32>
    %c0_10 = arith.constant 0 : index
    %c0_11 = arith.constant 0 : index
    %11 = vector.load %arg6[%c0_10, %c0_11] : memref<128x1xf32, #tpu.memory_space<vmem>>, vector<128x1xf32>
    %12 = vector.broadcast %11 : vector<128x1xf32> to vector<128x128xf32>
    %13 = arith.addf %10, %12 : vector<128x128xf32>
    %cst_12 = arith.constant 0.000000e+00 : f32
    %14 = vector.broadcast %cst_12 : f32 to vector<128x128xf32>
    %15 = arith.subf %14, %13 : vector<128x128xf32>
    %16 = math.exp %15 : vector<128x128xf32>
    %cst_13 = arith.constant 1.000000e+00 : f32
    %17 = vector.broadcast %cst_13 : f32 to vector<128x128xf32>
    %18 = arith.addf %17, %16 : vector<128x128xf32>
    %19 = tpu.reciprocal %18 : vector<128x128xf32> -> vector<128x128xf32>
    %c0_14 = arith.constant 0 : index
    %c0_15 = arith.constant 0 : index
    %c0_16 = arith.constant 0 : index
    %20 = vector.load %arg2[%c0_14, %c0_15, %c0_16] : memref<1x128x128xf32, #tpu.memory_space<vmem>>, vector<1x128x128xf32>
    %21 = vector.shape_cast %20 : vector<1x128x128xf32> to vector<128x128xf32>
    %22 = arith.mulf %21, %19 : vector<128x128xf32>
    %c0_17 = arith.constant 0 : index
    %c0_18 = arith.constant 0 : index
    %c0_19 = arith.constant 0 : index
    %23 = vector.load %arg7[%c0_17, %c0_18, %c0_19] : memref<1x128x128xf32, #tpu.memory_space<vmem>>, vector<1x128x128xf32>
    %24 = vector.shape_cast %23 : vector<1x128x128xf32> to vector<128x128xf32>
    %25 = vector.shape_cast %22 : vector<128x128xf32> to vector<1x128x128xf32>
    tpu.vector_store %arg7[%c0_17, %c0_18, %c0_19], %25 {strides = array<i32>} : memref<1x128x128xf32, #tpu.memory_space<vmem>>, vector<1x128x128xf32>,
    return
  }
  func.func @transform_0(%arg0: i32, %arg1: i32) -> (i32, i32, i32) {
    %c0_i32 = arith.constant 0 : i32
    %c0_i32_0 = arith.constant 0 : i32
    return %arg0, %c0_i32, %arg1 : i32, i32, i32
  }
  func.func @transform_1(%arg0: i32, %arg1: i32) -> (i32, i32) {
    %c0_i32 = arith.constant 0 : i32
    %c0_i32_0 = arith.constant 0 : i32
    %c0_i32_1 = arith.constant 0 : i32
    return %c0_i32, %c0_i32_0 : i32, i32
  }
  func.func @transform_2(%arg0: i32, %arg1: i32) -> (i32, i32) {
    %c0_i32 = arith.constant 0 : i32
    %c0_i32_0 = arith.constant 0 : i32
    %c0_i32_1 = arith.constant 0 : i32
    return %c0_i32, %c0_i32_0 : i32, i32
  }
  func.func @transform_3(%arg0: i32, %arg1: i32) -> (i32, i32) {
    %c0_i32 = arith.constant 0 : i32
    %c0_i32_0 = arith.constant 0 : i32
    %c0_i32_1 = arith.constant 0 : i32
    return %c0_i32, %c0_i32_0 : i32, i32
  }
  func.func @transform_4(%arg0: i32, %arg1: i32) -> (i32, i32) {
    %c0_i32 = arith.constant 0 : i32
    %c0_i32_0 = arith.constant 0 : i32
    %c0_i32_1 = arith.constant 0 : i32
    return %c0_i32, %c0_i32_0 : i32, i32
  }
  func.func @transform_5(%arg0: i32, %arg1: i32) -> (i32, i32, i32) {
    %c0_i32 = arith.constant 0 : i32
    %c0_i32_0 = arith.constant 0 : i32
    return %arg0, %c0_i32, %arg1 : i32, i32, i32
  }
}

</mosaic_0001>

<bundles_post_ra>
// kernel: tile.13
= control target key start
LH: loop header
LB: loop body
LE: loop exit
PB: predicated region body
PF: predicated region fallthrough
CT: control target
= control target key end

     0   :  { %s22_s0 = inlined_call_operand.vmem [shape: f32[8], index: 0, kind: input, shape index: {}]   ;;  %s23_s1 = inlined_call_operand.vmem [shape: f32[8,8], index: 1, kind: output, shape index: {}]  }
   0x1   :  { %v4_v0 = vld [vmem:[%s22_s0] ss:$0 sm:$0xff] }
   0x2   :  { %5 = vst [vmem:[%s23_s1] sm:$0xff] %v4_v0 }

// kernel: tile.18
= control target key start
LH: loop header
LB: loop body
LE: loop exit
PB: predicated region body
PF: predicated region fallthrough
CT: control target
= control target key end

     0   :  { %2 = vsyncpa [#allocation1], 0  ;;  %s48_s8 = smov [#allocation0]   ;;  %s65_s0 = inlined_call_operand.hbm [shape: f32[16], index: 0, kind: input, shape index: {}]   ;;  %s66_s1 = inlined_call_operand.vmem [shape: f32[8,16], index: 1, kind: output, shape index: {}]  }
   0x1   :  { %s8_s0 = sshll.u32 %s65_s0, 4  ;;  %s10_s9 = sshll.u32 %s48_s8, 4  ;;  %s9_s0 = int_to_ptr.hbm [resolvable:$true] %s8_s0  ;;  %s11_s9 = int_to_ptr.vmem [resolvable:$true] %s10_s9 }
   0x2   :  { %13 = dma.hbm_to_vmem [thread:$0]  %s9_s0, 16, %s11_s9, [#allocation1]  }
   0x3   :  { %46 = dma.done.wait [#allocation1], 16  }
   0x4   :  { %47 = vsyncadd [#allocation1], 4294967280  ;;  %v18_v0 = vld [vmem:[#allocation0] ss:$0 sm:$0xff] }
   0x5   :  { %19 = vst [vmem:[%s66_s1] sm:$0xff] %v18_v0 }
   0x6   :  { %20 = vsyncpa [#allocation1], 1 }

// kernel: tile.0
= control target key start
LH: loop header
LB: loop body
LE: loop exit
PB: predicated region body
PF: predicated region fallthrough
CT: control target
= control target key end

     0   :  { %vm3_vm0 = vcmask 7168   ;;  %s84_s8 = smov 125   ;;  %s85_s13 = smov 123   ;;  %s167_s0 = inlined_call_operand.vmem [shape: f32[8,8], index: 0, kind: input, shape index: {}]   ;;  %s168_s1 = inlined_call_operand.vmem [shape: f32[64,1], index: 1, kind: output, shape index: {}]  }
   0x1   :  { %v6_v0 = vld [vmem:[%s167_s0] sm:$0xff]   ;;  %s83_s0 = smov 127   ;;  %s86_s14 = smov 126  }
   0x2   :  { %7 = vrot.lane.b32.xlu0 %v6_v0, %s83_s0  ;;  %23 = vrot.lane.b32.xlu1 %v6_v0, %s84_s8  ;;  %4 = vst.msk [vmem:[%s168_s1] ss:$8 sm:$0xf] %vm3_vm0, %v6_v0   ;;  %s87_s15 = smov 124   ;;  %s88_s16 = smov 122  }
   0x3   :  { %5 = vst.msk [vmem:[%s168_s1] ss:$8 sm:$0xf0] %vm3_vm0, %v6_v0   ;;  %39 = vrot.lane.b32.xlu2 %v6_v0, %s85_s13  ;;  %s89_s17 = smov 121  }
   0xa   :  { %15 = vrot.lane.b32.xlu0 %v6_v0, %s86_s14  ;;  %31 = vrot.lane.b32.xlu1 %v6_v0, %s87_s15 }
   0xb   :  { %47 = vrot.lane.b32.xlu2 %v6_v0, %s88_s16 }
  0x12   :  { %55 = vrot.lane.b32.xlu0 %v6_v0, %s89_s17 }
  0x5d   :  { %v40_v1 = vpop.permute.xlu2 %39  }
  0x5e   :  { %70 = vst.msk [vmem:[%s168_s1 + $0x5] ss:$8 sm:$0xf] %vm3_vm0, %v40_v1  }
  0x5f   :  { %71 = vst.msk [vmem:[%s168_s1 + $0x5] ss:$8 sm:$0xf0] %vm3_vm0, %v40_v1  }
  0x65   :  { %v48_v2 = vpop.permute.xlu2 %47  }
  0x66   :  { %72 = vst.msk [vmem:[%s168_s1 + $0x6] ss:$8 sm:$0xf] %vm3_vm0, %v48_v2  }
  0x67   :  { %73 = vst.msk [vmem:[%s168_s1 + $0x6] ss:$8 sm:$0xf0] %vm3_vm0, %v48_v2  }
  0x74   :  { %v8_v3 = vpop.permute.xlu0 %7   ;;  %v24_v4 = vpop.permute.xlu1 %23  }
  0x75   :  { %62 = vst.msk [vmem:[%s168_s1 + $0x1] ss:$8 sm:$0xf] %vm3_vm0, %v8_v3  }
  0x76   :  { %63 = vst.msk [vmem:[%s168_s1 + $0x1] ss:$8 sm:$0xf0] %vm3_vm0, %v8_v3  }
  0x77   :  { %66 = vst.msk [vmem:[%s168_s1 + $0x3] ss:$8 sm:$0xf] %vm3_vm0, %v24_v4  }
  0x78   :  { %67 = vst.msk [vmem:[%s168_s1 + $0x3] ss:$8 sm:$0xf0] %vm3_vm0, %v24_v4  }
  0x7c   :  { %v16_v5 = vpop.permute.xlu0 %15   ;;  %v32_v6 = vpop.permute.xlu1 %31  }
  0x7d   :  { %64 = vst.msk [vmem:[%s168_s1 + $0x2] ss:$8 sm:$0xf] %vm3_vm0, %v16_v5  }
  0x7e   :  { %65 = vst.msk [vmem:[%s168_s1 + $0x2] ss:$8 sm:$0xf0] %vm3_vm0, %v16_v5  }
  0x7f   :  { %68 = vst.msk [vmem:[%s168_s1 + $0x4] ss:$8 sm:$0xf] %vm3_vm0, %v32_v6  }
  0x80   :  { %69 = vst.msk [vmem:[%s168_s1 + $0x4] ss:$8 sm:$0xf0] %vm3_vm0, %v32_v6  }
  0x84   :  { %v56_v7 = vpop.permute.xlu0 %55  }
  0x85   :  { %74 = vst.msk [vmem:[%s168_s1 + $0x7] ss:$8 sm:$0xf] %vm3_vm0, %v56_v7  }
  0x86   :  { %75 = vst.msk [vmem:[%s168_s1 + $0x7] ss:$8 sm:$0xf0] %vm3_vm0, %v56_v7  }

// kernel: tile.1
= control target key start
LH: loop header
LB: loop body
LE: loop exit
PB: predicated region body
PF: predicated region fallthrough
CT: control target
= control target key end

     0   :  { %s264_s8 = smov 127   ;;  %s265_s9 = smov 123   ;;  %vm3_vm0 = vcmask 7168   ;;  %s547_s0 = inlined_call_operand.vmem [shape: f32[8,16], index: 0, kind: input, shape index: {}]   ;;  %s548_s1 = inlined_call_operand.vmem [shape: f32[128,1], index: 1, kind: output, shape index: {}]  }
   0x1   :  { %v32_v0 = vld [vmem:[%s547_s0] sm:$0xff]   ;;  %s263_s0 = smov 125   ;;  %s266_s18 = smov 124  }
   0x2   :  { %33 = vrot.lane.b32.xlu1 %v32_v0, %s263_s0  ;;  %9 = vrot.lane.b32.xlu0 %v32_v0, %s264_s8  ;;  %4 = vst.msk [vmem:[%s548_s1] ss:$16 sm:$0x3] %vm3_vm0, %v32_v0   ;;  %s267_s19 = smov 126   ;;  %s268_s20 = smov 122  }
   0x3   :  { %57 = vrot.lane.b32.xlu2 %v32_v0, %s265_s9  ;;  %5 = vst.msk [vmem:[%s548_s1] ss:$16 sm:$0xc] %vm3_vm0, %v32_v0   ;;  %s269_s21 = smov 120   ;;  %s270_s22 = smov 121  }
   0x4   :  { %6 = vst.msk [vmem:[%s548_s1] ss:$16 sm:$0x30] %vm3_vm0, %v32_v0   ;;  %s271_s23 = smov 119   ;;  %s272_s24 = smov 117  }
   0x5   :  { %7 = vst.msk [vmem:[%s548_s1] ss:$16 sm:$0xc0] %vm3_vm0, %v32_v0   ;;  %s273_s25 = smov 118   ;;  %s274_s26 = smov 116  }
   0x6   :  { %s275_s27 = smov 114   ;;  %s276_s28 = smov 115  }
   0x7   :  { %s277_s29 = smov 113  }
   0xa   :  { %45 = vrot.lane.b32.xlu1 %v32_v0, %s266_s18  ;;  %21 = vrot.lane.b32.xlu0 %v32_v0, %s267_s19 }
   0xb   :  { %69 = vrot.lane.b32.xlu2 %v32_v0, %s268_s20 }
  0x12   :  { %93 = vrot.lane.b32.xlu1 %v32_v0, %s269_s21  ;;  %81 = vrot.lane.b32.xlu0 %v32_v0, %s270_s22 }
  0x13   :  { %105 = vrot.lane.b32.xlu2 %v32_v0, %s271_s23 }
  0x1a   :  { %129 = vrot.lane.b32.xlu1 %v32_v0, %s272_s24  ;;  %117 = vrot.lane.b32.xlu0 %v32_v0, %s273_s25 }
  0x1b   :  { %141 = vrot.lane.b32.xlu2 %v32_v0, %s274_s26 }
  0x22   :  { %165 = vrot.lane.b32.xlu1 %v32_v0, %s275_s27  ;;  %153 = vrot.lane.b32.xlu0 %v32_v0, %s276_s28 }
  0x23   :  { %177 = vrot.lane.b32.xlu2 %v32_v0, %s277_s29 }
  0x5d   :  { %v58_v1 = vpop.permute.xlu2 %57  }
  0x5e   :  { %204 = vst.msk [vmem:[%s548_s1 + $0x5] ss:$16 sm:$0x3] %vm3_vm0, %v58_v1  }
  0x5f   :  { %205 = vst.msk [vmem:[%s548_s1 + $0x5] ss:$16 sm:$0xc] %vm3_vm0, %v58_v1  }
  0x60   :  { %206 = vst.msk [vmem:[%s548_s1 + $0x5] ss:$16 sm:$0x30] %vm3_vm0, %v58_v1  }
  0x61   :  { %207 = vst.msk [vmem:[%s548_s1 + $0x5] ss:$16 sm:$0xc0] %vm3_vm0, %v58_v1  }
  0x65   :  { %v70_v2 = vpop.permute.xlu2 %69  }
  0x66   :  { %208 = vst.msk [vmem:[%s548_s1 + $0x6] ss:$16 sm:$0x3] %vm3_vm0, %v70_v2  }
  0x67   :  { %209 = vst.msk [vmem:[%s548_s1 + $0x6] ss:$16 sm:$0xc] %vm3_vm0, %v70_v2  }
  0x68   :  { %210 = vst.msk [vmem:[%s548_s1 + $0x6] ss:$16 sm:$0x30] %vm3_vm0, %v70_v2  }
  0x69   :  { %211 = vst.msk [vmem:[%s548_s1 + $0x6] ss:$16 sm:$0xc0] %vm3_vm0, %v70_v2  }
  0x6d   :  { %v106_v3 = vpop.permute.xlu2 %105  }
  0x6e   :  { %220 = vst.msk [vmem:[%s548_s1 + $0x9] ss:$16 sm:$0x3] %vm3_vm0, %v106_v3  }
  0x6f   :  { %221 = vst.msk [vmem:[%s548_s1 + $0x9] ss:$16 sm:$0xc] %vm3_vm0, %v106_v3  }
  0x70   :  { %222 = vst.msk [vmem:[%s548_s1 + $0x9] ss:$16 sm:$0x30] %vm3_vm0, %v106_v3  }
  0x71   :  { %223 = vst.msk [vmem:[%s548_s1 + $0x9] ss:$16 sm:$0xc0] %vm3_vm0, %v106_v3  }
  0x74   :  { %v34_v4 = vpop.permute.xlu1 %33   ;;  %v10_v5 = vpop.permute.xlu0 %9  }
  0x75   :  { %196 = vst.msk [vmem:[%s548_s1 + $0x3] ss:$16 sm:$0x3] %vm3_vm0, %v34_v4   ;;  %v142_v6 = vpop.permute.xlu2 %141  }
  0x76   :  { %197 = vst.msk [vmem:[%s548_s1 + $0x3] ss:$16 sm:$0xc] %vm3_vm0, %v34_v4  }
  0x77   :  { %198 = vst.msk [vmem:[%s548_s1 + $0x3] ss:$16 sm:$0x30] %vm3_vm0, %v34_v4  }
  0x78   :  { %199 = vst.msk [vmem:[%s548_s1 + $0x3] ss:$16 sm:$0xc0] %vm3_vm0, %v34_v4  }
  0x79   :  { %188 = vst.msk [vmem:[%s548_s1 + $0x1] ss:$16 sm:$0x3] %vm3_vm0, %v10_v5  }
  0x7a   :  { %189 = vst.msk [vmem:[%s548_s1 + $0x1] ss:$16 sm:$0xc] %vm3_vm0, %v10_v5  }
  0x7b   :  { %190 = vst.msk [vmem:[%s548_s1 + $0x1] ss:$16 sm:$0x30] %vm3_vm0, %v10_v5  }
  0x7c   :  { %191 = vst.msk [vmem:[%s548_s1 + $0x1] ss:$16 sm:$0xc0] %vm3_vm0, %v10_v5   ;;  %v46_v7 = vpop.permute.xlu1 %45   ;;  %v22_v8 = vpop.permute.xlu0 %21  }
  0x7d   :  { %200 = vst.msk [vmem:[%s548_s1 + $0x4] ss:$16 sm:$0x3] %vm3_vm0, %v46_v7   ;;  %v178_v9 = vpop.permute.xlu2 %177  }
  0x7e   :  { %201 = vst.msk [vmem:[%s548_s1 + $0x4] ss:$16 sm:$0xc] %vm3_vm0, %v46_v7  }
  0x7f   :  { %202 = vst.msk [vmem:[%s548_s1 + $0x4] ss:$16 sm:$0x30] %vm3_vm0, %v46_v7  }
  0x80   :  { %203 = vst.msk [vmem:[%s548_s1 + $0x4] ss:$16 sm:$0xc0] %vm3_vm0, %v46_v7  }
  0x81   :  { %192 = vst.msk [vmem:[%s548_s1 + $0x2] ss:$16 sm:$0x3] %vm3_vm0, %v22_v8  }
  0x82   :  { %193 = vst.msk [vmem:[%s548_s1 + $0x2] ss:$16 sm:$0xc] %vm3_vm0, %v22_v8  }
  0x83   :  { %194 = vst.msk [vmem:[%s548_s1 + $0x2] ss:$16 sm:$0x30] %vm3_vm0, %v22_v8  }
  0x84   :  { %195 = vst.msk [vmem:[%s548_s1 + $0x2] ss:$16 sm:$0xc0] %vm3_vm0, %v22_v8   ;;  %v94_v10 = vpop.permute.xlu1 %93   ;;  %v82_v11 = vpop.permute.xlu0 %81  }
  0x85   :  { %216 = vst.msk [vmem:[%s548_s1 + $0x8] ss:$16 sm:$0x3] %vm3_vm0, %v94_v10  }
  0x86   :  { %217 = vst.msk [vmem:[%s548_s1 + $0x8] ss:$16 sm:$0xc] %vm3_vm0, %v94_v10  }
  0x87   :  { %218 = vst.msk [vmem:[%s548_s1 + $0x8] ss:$16 sm:$0x30] %vm3_vm0, %v94_v10  }
  0x88   :  { %219 = vst.msk [vmem:[%s548_s1 + $0x8] ss:$16 sm:$0xc0] %vm3_vm0, %v94_v10  }
  0x89   :  { %212 = vst.msk [vmem:[%s548_s1 + $0x7] ss:$16 sm:$0x3] %vm3_vm0, %v82_v11  }
  0x8a   :  { %213 = vst.msk [vmem:[%s548_s1 + $0x7] ss:$16 sm:$0xc] %vm3_vm0, %v82_v11  }
  0x8b   :  { %214 = vst.msk [vmem:[%s548_s1 + $0x7] ss:$16 sm:$0x30] %vm3_vm0, %v82_v11  }
  0x8c   :  { %215 = vst.msk [vmem:[%s548_s1 + $0x7] ss:$16 sm:$0xc0] %vm3_vm0, %v82_v11   ;;  %v130_v12 = vpop.permute.xlu1 %129   ;;  %v118_v13 = vpop.permute.xlu0 %117  }
  0x8d   :  { %232 = vst.msk [vmem:[%s548_s1 + $0xc] ss:$16 sm:$0x3] %vm3_vm0, %v142_v6  }
  0x8e   :  { %233 = vst.msk [vmem:[%s548_s1 + $0xc] ss:$16 sm:$0xc] %vm3_vm0, %v142_v6  }
  0x8f   :  { %234 = vst.msk [vmem:[%s548_s1 + $0xc] ss:$16 sm:$0x30] %vm3_vm0, %v142_v6  }
  0x90   :  { %235 = vst.msk [vmem:[%s548_s1 + $0xc] ss:$16 sm:$0xc0] %vm3_vm0, %v142_v6  }
  0x91   :  { %228 = vst.msk [vmem:[%s548_s1 + $0xb] ss:$16 sm:$0x3] %vm3_vm0, %v130_v12  }
  0x92   :  { %229 = vst.msk [vmem:[%s548_s1 + $0xb] ss:$16 sm:$0xc] %vm3_vm0, %v130_v12  }
  0x93   :  { %230 = vst.msk [vmem:[%s548_s1 + $0xb] ss:$16 sm:$0x30] %vm3_vm0, %v130_v12  }
  0x94   :  { %231 = vst.msk [vmem:[%s548_s1 + $0xb] ss:$16 sm:$0xc0] %vm3_vm0, %v130_v12   ;;  %v166_v14 = vpop.permute.xlu1 %165   ;;  %v154_v15 = vpop.permute.xlu0 %153  }
  0x95   :  { %224 = vst.msk [vmem:[%s548_s1 + $0xa] ss:$16 sm:$0x3] %vm3_vm0, %v118_v13  }
  0x96   :  { %225 = vst.msk [vmem:[%s548_s1 + $0xa] ss:$16 sm:$0xc] %vm3_vm0, %v118_v13  }
  0x97   :  { %226 = vst.msk [vmem:[%s548_s1 + $0xa] ss:$16 sm:$0x30] %vm3_vm0, %v118_v13  }
  0x98   :  { %227 = vst.msk [vmem:[%s548_s1 + $0xa] ss:$16 sm:$0xc0] %vm3_vm0, %v118_v13  }
  0x99   :  { %244 = vst.msk [vmem:[%s548_s1 + $0xf] ss:$16 sm:$0x3] %vm3_vm0, %v178_v9  }
  0x9a   :  { %245 = vst.msk [vmem:[%s548_s1 + $0xf] ss:$16 sm:$0xc] %vm3_vm0, %v178_v9  }
  0x9b   :  { %246 = vst.msk [vmem:[%s548_s1 + $0xf] ss:$16 sm:$0x30] %vm3_vm0, %v178_v9  }
  0x9c   :  { %247 = vst.msk [vmem:[%s548_s1 + $0xf] ss:$16 sm:$0xc0] %vm3_vm0, %v178_v9  }
  0x9d   :  { %240 = vst.msk [vmem:[%s548_s1 + $0xe] ss:$16 sm:$0x3] %vm3_vm0, %v166_v14  }
  0x9e   :  { %241 = vst.msk [vmem:[%s548_s1 + $0xe] ss:$16 sm:$0xc] %vm3_vm0, %v166_v14  }
  0x9f   :  { %242 = vst.msk [vmem:[%s548_s1 + $0xe] ss:$16 sm:$0x30] %vm3_vm0, %v166_v14  }
  0xa0   :  { %243 = vst.msk [vmem:[%s548_s1 + $0xe] ss:$16 sm:$0xc0] %vm3_vm0, %v166_v14  }
  0xa1   :  { %236 = vst.msk [vmem:[%s548_s1 + $0xd] ss:$16 sm:$0x3] %vm3_vm0, %v154_v15  }
  0xa2   :  { %237 = vst.msk [vmem:[%s548_s1 + $0xd] ss:$16 sm:$0xc] %vm3_vm0, %v154_v15  }
  0xa3   :  { %238 = vst.msk [vmem:[%s548_s1 + $0xd] ss:$16 sm:$0x30] %vm3_vm0, %v154_v15  }
  0xa4   :  { %239 = vst.msk [vmem:[%s548_s1 + $0xd] ss:$16 sm:$0xc0] %vm3_vm0, %v154_v15  }

// kernel: local_temporal_module.1
= control target key start
LH: loop header
LB: loop body
LE: loop exit
PB: predicated region body
PF: predicated region fallthrough
CT: control target
= control target key end

     0   :  { %s1454_s18 = smov 0   ;;  %s1456_s19 = smov 0   ;;  %s2048_s0 = inlined_call_operand.vmem [shape: f32[2,128,256], index: 0, kind: input, shape index: {}]   ;;  %s2049_s1 = inlined_call_operand.vmem [shape: f32[64,128], index: 1, kind: input, shape index: {}]   ;;  %s2050_s2 = inlined_call_operand.vmem [shape: f32[128,64], index: 2, kind: input, shape index: {}]   ;;  %s2051_s3 = inlined_call_operand.vmem [shape: f32[64,1], index: 3, kind: input, shape index: {}]   ;;  %s2052_s4 = inlined_call_operand.vmem [shape: f32[128,1], index: 4, kind: input, shape index: {}]   ;;  %s2053_s5 = inlined_call_operand.vmem [shape: f32[2,128,256], index: 5, kind: output, shape index: {}]  }
   0x1   :  { %s1458_s20 = smov 0   ;;  %s1460_s21 = smov 0  }
   0x2   :  { %s1462_s22 = smov 0   ;;  %s1464_s23 = smov 0  }
   0x3   :  { %s1466_s24 = smov 0  }
   0x4 LB: > { %s24_s25 = sadd.s32 1, %s1413_s22  ;;  %s27_s26 = sadd.s32 1, %s1417_s23  ;;  %s1421_s24 = sphi %s1466_s24, %s15_s24   ;;  %s1417_s23 = sphi %s1464_s23, %s2080_s23   ;;  %s1413_s22 = sphi %s1462_s22, %s2079_s22   ;;  %s1409_s21 = sphi %s1460_s21, %s2078_s21   ;;  %s1405_s20 = sphi %s1458_s20, %s2077_s20   ;;  %s1401_s19 = sphi %s1456_s19, %s2076_s19   ;;  %s1397_s18 = sphi %s1454_s18, %s2075_s18  }
   0x5   : > { %p25_p0 = scmp.ge.s32.totalorder %s24_s25, 2  ;;  %s1175_s27 = sadd.s32 4294967295, %s1421_s24  }
   0x6   : > { %p43_p1 = scmp.ne.s32.totalorder %s1401_s19, %s1397_s18  ;;  %p44_p2 = scmp.eq.s32.totalorder %s1421_s24, 0 }
   0x7   : > { %s2082_s25 = smov (%p25_p0, %s24_s25), 0  ;;  %s2084_s26 = smov (!%p25_p0, %s27_s26), %s1417_s23 }
   0x8   : > { %p29_p3 = scmp.ge.s32.totalorder %s2084_s26, 2  ;;  %p159_p4 = scmp.eq.s32.totalorder %s1175_s27, 3 }
   0x9   : > { %s32_s28 = ssub.s32 %s1413_s22, %s2082_s25  ;;  %p45_p5 = por %p44_p2, %p43_p1 }
   0xa   : > { %s2086_s26 = smov (%p29_p3, %s2084_s26), 0  ;;  %p1502_p6 = por %p159_p4, %p43_p1 }
   0xb   : > { %s31_s30 = ssub.s32 %s1417_s23, %s2086_s26  ;;  %s36_s7 = sadd.s32 1, %s1401_s19 }
   0xc   : > { %s33_s6 = sor.u32 %s32_s28, %s31_s30  ;;  %p1178_p8 = scmp.ge.s32.totalorder %s1421_s24, 4 }
   0xd   : > { %p34_p7 = scmp.eq.s32.totalorder %s33_s6, 0 }
   0xe   : > { %193 = sbr.rel (%p1178_p8) target bundleno = 41 (0x29), region = 32 }
   0xf   : > { %s1510_s8 = scalar_select %p34_p7, %s1401_s19, %s36_s7  }
  0x13   : > { %196 = sbr.rel (!%p45_p5) target bundleno = 41 (0x29), region = 36  ;;  %s198_s9 = sand.u32 (%p45_p5), 1, %s1401_s19  }
  0x14   : > { %s1180_s10 = sshll.u32 (%p45_p5), %s1417_s23, 5  ;;  %s1179_s11 = sshll.u32 (%p45_p5), %s198_s9, 7 }
  0x15   : > { %s202_s12 = sadd.s32 (%p45_p5), %s1413_s22, %s1180_s10  ;;  %s200_s17 = scalar_lea.vmem (%p45_p5), [#allocation2], %s1179_s11 }
  0x16   : > { %s1181_s13 = sshll.u32 (%p45_p5), %s202_s12, 3 }
  0x17   : > { %s1519_s16 = scalar_lea.vmem (%p45_p5), %s2048_s0, %s1181_s13 }
  0x18   : > { %v263_v0 = vld [vmem:[%s1519_s16] sm:$0xff]  ;;  %v265_v1 = vld [vmem:[%s1519_s16 + $0x10] sm:$0xff] }
  0x19   : > { %v267_v2 = vld [vmem:[%s1519_s16 + $0x20] sm:$0xff]  ;;  %264 = vst [vmem:[%s200_s17] sm:$0xff] %v263_v0  ;;  %v269_v3 = vld [vmem:[%s1519_s16 + $0x30] sm:$0xff] }
  0x1a   : > { %266 = vst [vmem:[%s200_s17 + $0x8] sm:$0xff] %v265_v1  ;;  %v271_v4 = vld [vmem:[%s1519_s16 + $0x40] sm:$0xff]  ;;  %v273_v5 = vld [vmem:[%s1519_s16 + $0x50] sm:$0xff] }
  0x1b   : > { %268 = vst [vmem:[%s200_s17 + $0x10] sm:$0xff] %v267_v2  ;;  %v275_v6 = vld [vmem:[%s1519_s16 + $0x60] sm:$0xff]  ;;  %v277_v7 = vld [vmem:[%s1519_s16 + $0x70] sm:$0xff] }
  0x1c   : > { %270 = vst [vmem:[%s200_s17 + $0x18] sm:$0xff] %v269_v3  ;;  %v279_v8 = vld [vmem:[%s1519_s16 + $0x80] sm:$0xff]  ;;  %v281_v9 = vld [vmem:[%s1519_s16 + $0x90] sm:$0xff] }
  0x1d   : > { %272 = vst [vmem:[%s200_s17 + $0x20] sm:$0xff] %v271_v4  ;;  %v283_v10 = vld [vmem:[%s1519_s16 + $0xa0] sm:$0xff]  ;;  %v285_v11 = vld [vmem:[%s1519_s16 + $0xb0] sm:$0xff] }
  0x1e   : > { %274 = vst [vmem:[%s200_s17 + $0x28] sm:$0xff] %v273_v5  ;;  %v287_v12 = vld [vmem:[%s1519_s16 + $0xc0] sm:$0xff]  ;;  %v289_v13 = vld [vmem:[%s1519_s16 + $0xd0] sm:$0xff] }
  0x1f   : > { %276 = vst [vmem:[%s200_s17 + $0x30] sm:$0xff] %v275_v6  ;;  %v291_v14 = vld [vmem:[%s1519_s16 + $0xe0] sm:$0xff]  ;;  %v293_v15 = vld [vmem:[%s1519_s16 + $0xf0] sm:$0xff] }
  0x20   : > { %278 = vst [vmem:[%s200_s17 + $0x38] sm:$0xff] %v277_v7 }
  0x21   : > { %280 = vst [vmem:[%s200_s17 + $0x40] sm:$0xff] %v279_v8 }
  0x22   : > { %282 = vst [vmem:[%s200_s17 + $0x48] sm:$0xff] %v281_v9 }
  0x23   : > { %284 = vst [vmem:[%s200_s17 + $0x50] sm:$0xff] %v283_v10 }
  0x24   : > { %286 = vst [vmem:[%s200_s17 + $0x58] sm:$0xff] %v285_v11 }
  0x25   : > { %288 = vst [vmem:[%s200_s17 + $0x60] sm:$0xff] %v287_v12 }
  0x26   : > { %290 = vst [vmem:[%s200_s17 + $0x68] sm:$0xff] %v289_v13 }
  0x27   : > { %292 = vst [vmem:[%s200_s17 + $0x70] sm:$0xff] %v291_v14 }
  0x28   : > { %294 = vst [vmem:[%s200_s17 + $0x78] sm:$0xff] %v293_v15 }
  0x29 PF: > { %p1182_p9 = scmp.ge.s32.totalorder %s1421_s24, 1  ;;  %p299_p10 = scmp.lt.s32.totalorder %s1421_s24, 5 }
  0x2b   : > { %p300_p11 = pnand %p1182_p9, %p299_p10 }
  0x2c   : > { %s306_s27 = sand.u32 (!%p300_p11), 1, %s1397_s18  }
  0x2d   : > { %303 = sbr.rel (%p300_p11) target bundleno = 487 (0x1e7), region = 74  ;;  %s1546_s9 = sshll.u32 (!%p300_p11), %s306_s27, 7 }
  0x2e   : > { %s1549_s10 = scalar_lea.vmem (!%p300_p11), [#allocation2], %s1546_s9  ;;  %s1817_s11 = scalar_lea.vmem (!%p300_p11), [#allocation3], %s1546_s9 }
  0x32   : > { %v363_v16 = vld [vmem:[%s2051_s3 + $0x38] sm:$0xff]  ;;  %v361_v17 = vld [vmem:[%s2051_s3 + $0x28] sm:$0xff]  ;;  %v1423_v18 = vmov 0   ;;  %v1555_v20 = vld [vmem:[%s1549_s10 + $0x70] sm:$0xff]  ;;  %vm565_vm0 = vcmask 523264   ;;  %s1202_s9 = sshll.u32 (%p1502_p6), %s1409_s21, 5 }
  0x33   : > { %1295 = vset.pattern.permute.xlu0 %v1423_v18  ;;  %1296 = vset.pattern.permute.xlu1 %v1423_v18  ;;  %v1552_v19 = vld [vmem:[%s1549_s10 + $0x78] sm:$0xff]  ;;  %v345_v21 = vld [vmem:[%s1549_s10 + $0x68] sm:$0xff]  ;;  %v344_v22 = vld [vmem:[%s1549_s10 + $0x60] sm:$0xff]  ;;  %s1007_s12 = sadd.s32 (%p1502_p6), %s1405_s20, %s1202_s9 }
  0x34   : > { %401 = vperm.xlu0 %1295, %v363_v16   ;;  %391 = vperm.xlu1 %1296, %v361_v17   ;;  %v362_v23 = vld [vmem:[%s2051_s3 + $0x30] sm:$0xff]  ;;  %v360_v24 = vld [vmem:[%s2051_s3 + $0x20] sm:$0xff]  ;;  %v359_v25 = vld [vmem:[%s2051_s3 + $0x18] sm:$0xff] }
  0x35   : > { %1297 = vset.pattern.permute.xlu2 %v1423_v18  ;;  %404 = vmatpush.msra.mxu0 %v1552_v19  ;;  %v343_v26 = vld [vmem:[%s1549_s10 + $0x58] sm:$0xff]  ;;  %v1574_v27 = vld [vmem:[%s1549_s10 + $0x50] sm:$0xff]  ;;  %v1577_v28 = vld [vmem:[%s1549_s10 + $0x48] sm:$0xff] }
  0x36   : > { %1206 = vmatpush.msra.mxu3 %v1552_v19  ;;  %381 = vperm.xlu2 %1297, %v359_v25   ;;  %v358_v29 = vld [vmem:[%s2051_s3 + $0x10] sm:$0xff]  ;;  %v1585_v30 = vld [vmem:[%s1549_s10 + $0x40] sm:$0xff]  ;;  %v357_v31 = vld [vmem:[%s2051_s3 + $0x8] sm:$0xff] }
  0x37   : > { %405 = vmatpush.msra.mxu0 %v1555_v20  ;;  %v356_v32 = vld [vmem:[%s2051_s3] sm:$0xff]  ;;  %v1596_v33 = vld [vmem:[%s1549_s10 + $0x38] sm:$0xff]  ;;  %v338_v34 = vld [vmem:[%s1549_s10 + $0x30] sm:$0xff] }
  0x38   : > { %1207 = vmatpush.msra.mxu3 %v1555_v20  ;;  %v337_v35 = vld [vmem:[%s1549_s10 + $0x28] sm:$0xff]  ;;  %v469_v36 = vld [vmem:[%s2052_s4] sm:$0xff]  ;;  %v471_v39 = vld [vmem:[%s2052_s4 + $0x10] sm:$0xff] }
  0x39   : > { %406 = vmatpush.msra.mxu0 %v345_v21  ;;  %v1608_v37 = vld [vmem:[%s1549_s10 + $0x20] sm:$0xff]  ;;  %v470_v38 = vld [vmem:[%s2052_s4 + $0x8] sm:$0xff]  ;;  %v1617_v40 = vld [vmem:[%s1549_s10 + $0x18] sm:$0xff] }
  0x3a   : > { %1208 = vmatpush.msra.mxu3 %v345_v21  ;;  %v1622_v41 = vld [vmem:[%s1549_s10 + $0x10] sm:$0xff]  ;;  %v1627_v42 = vld [vmem:[%s1549_s10 + $0x8] sm:$0xff]  ;;  %v472_v43 = vld [vmem:[%s2052_s4 + $0x18] sm:$0xff] }
  0x3b   : > { %407 = vmatpush.msra.mxu0 %v344_v22  ;;  %v1635_v44 = vld [vmem:[%s1549_s10] sm:$0xff]  ;;  %v353_v46 = vld [vmem:[%s2049_s1 + $0x28] sm:$0xff]  ;;  %v475_v49 = vld [vmem:[%s2052_s4 + $0x30] sm:$0xff] }
  0x3c   : > { %1209 = vmatpush.msra.mxu3 %v344_v22  ;;  %396 = vperm.xlu0 %1295, %v362_v23   ;;  %v348_v45 = vld [vmem:[%s2049_s1] sm:$0xff]  ;;  %v474_v48 = vld [vmem:[%s2052_s4 + $0x28] sm:$0xff]  ;;  %v354_v51 = vld [vmem:[%s2049_s1 + $0x30] sm:$0xff] }
  0x3d   : > { %386 = vperm.xlu1 %1296, %v360_v24   ;;  %408 = vmatpush.msra.mxu0 %v343_v26  ;;  %v473_v47 = vld [vmem:[%s2052_s4 + $0x20] sm:$0xff]  ;;  %v349_v50 = vld [vmem:[%s2049_s1 + $0x8] sm:$0xff]  ;;  %v476_v52 = vld [vmem:[%s2052_s4 + $0x38] sm:$0xff] }
  0x3e   : > { %1210 = vmatpush.msra.mxu3 %v343_v26  ;;  %376 = vperm.xlu2 %1297, %v358_v29   ;;  %v477_v53 = vld [vmem:[%s2052_s4 + $0x40] sm:$0xff]  ;;  %v478_v54 = vld [vmem:[%s2052_s4 + $0x48] sm:$0xff]  ;;  %v350_v55 = vld [vmem:[%s2049_s1 + $0x10] sm:$0xff] }
  0x3f   : > { %409 = vmatpush.msra.mxu0 %v1574_v27  ;;  %v355_v56 = vld [vmem:[%s2049_s1 + $0x38] sm:$0xff]  ;;  %v479_v57 = vld [vmem:[%s2052_s4 + $0x50] sm:$0xff]  ;;  %v481_v59 = vld [vmem:[%s2052_s4 + $0x60] sm:$0xff] }
  0x40   : > { %1211 = vmatpush.msra.mxu3 %v1574_v27  ;;  %v480_v58 = vld [vmem:[%s2052_s4 + $0x58] sm:$0xff]  ;;  %v482_v61 = vld [vmem:[%s2052_s4 + $0x68] sm:$0xff]  ;;  %v483_v62 = vld [vmem:[%s2052_s4 + $0x70] sm:$0xff] }
  0x41   : > { %410 = vmatpush.msra.mxu0 %v1577_v28  ;;  %v351_v60 = vld [vmem:[%s2049_s1 + $0x18] sm:$0xff]  ;;  %v352_v0 = vld [vmem:[%s2049_s1 + $0x20] sm:$0xff] }
  0x42   : > { %1212 = vmatpush.msra.mxu3 %v1577_v28  ;;  %v484_v63 = vld [vmem:[%s2052_s4 + $0x78] sm:$0xff] }
  0x43   : > { %411 = vmatpush.msra.mxu0 %v1585_v30 }
  0x44   : > { %1213 = vmatpush.msra.mxu3 %v1585_v30  ;;  %371 = vperm.xlu0 %1295, %v357_v31  }
  0x45   : > { %366 = vperm.xlu1 %1296, %v356_v32   ;;  %412 = vmatpush.msra.mxu0 %v1596_v33 }
  0x46   : > { %1214 = vmatpush.msra.mxu3 %v1596_v33  ;;  %487 = vperm.xlu2 %1297, %v469_v36  }
  0x47   : > { %413 = vmatpush.msra.mxu0 %v338_v34 }
  0x48   : > { %1215 = vmatpush.msra.mxu3 %v338_v34 }
  0x49   : > { %414 = vmatpush.msra.mxu0 %v337_v35 }
  0x4a   : > { %1216 = vmatpush.msra.mxu3 %v337_v35 }
  0x4b   : > { %415 = vmatpush.msra.mxu0 %v1608_v37 }
  0x4c   : > { %1217 = vmatpush.msra.mxu3 %v1608_v37  ;;  %492 = vperm.xlu0 %1295, %v470_v38  }
  0x4d   : > { %497 = vperm.xlu1 %1296, %v471_v39   ;;  %416 = vmatpush.msra.mxu0 %v1617_v40 }
  0x4e   : > { %1218 = vmatpush.msra.mxu3 %v1617_v40  ;;  %502 = vperm.xlu2 %1297, %v472_v43   ;;  %v453_v43 = vld [vmem:[%s2050_s2] sm:$0xff] }
  0x4f   : > { %417 = vmatpush.msra.mxu0 %v1622_v41 }
  0x50   : > { %1219 = vmatpush.msra.mxu3 %v1622_v41 }
  0x51   : > { %418 = vmatpush.msra.mxu0 %v1627_v42 }
  0x52   : > { %1220 = vmatpush.msra.mxu3 %v1627_v42 }
  0x53   : > { %419 = vmatpush.msra.mxu0 %v1635_v44 }
  0x54   : > { %1221 = vmatpush.msra.mxu3 %v1635_v44  ;;  %420 = vmatmul.f32.vlgmr.msra.gmra.mxu0 %v348_v45  ;;  %v460_v45 = vld [vmem:[%s2050_s2 + $0x38] sm:$0xff] }
  0x55   : > { %435 = vmatmul.f32.vlgmr.msra.gmra.mxu3 %v353_v46  ;;  %507 = vperm.xlu0 %1295, %v473_v47   ;;  %v467_v46 = vld [vmem:[%s2050_s2 + $0x70] sm:$0xff]  ;;  %v454_v47 = vld [vmem:[%s2050_s2 + $0x8] sm:$0xff] }
  0x56   : > { %512 = vperm.xlu1 %1296, %v474_v48   ;;  %517 = vperm.xlu2 %1297, %v475_v49   ;;  %v461_v48 = vld [vmem:[%s2050_s2 + $0x40] sm:$0xff]  ;;  %v468_v49 = vld [vmem:[%s2050_s2 + $0x78] sm:$0xff] }
  0x5c   : > { %423 = vmatmul.f32.gmra.mxu0 %v349_v50  ;;  %v455_v50 = vld [vmem:[%s2050_s2 + $0x10] sm:$0xff] }
  0x5d   : > { %438 = vmatmul.f32.gmra.mxu3 %v354_v51  ;;  %522 = vperm.xlu0 %1295, %v476_v52   ;;  %v462_v51 = vld [vmem:[%s2050_s2 + $0x48] sm:$0xff]  ;;  %v456_v52 = vld [vmem:[%s2050_s2 + $0x18] sm:$0xff] }
  0x5e   : > { %527 = vperm.xlu1 %1296, %v477_v53   ;;  %532 = vperm.xlu2 %1297, %v478_v54   ;;  %v463_v53 = vld [vmem:[%s2050_s2 + $0x50] sm:$0xff]  ;;  %v457_v54 = vld [vmem:[%s2050_s2 + $0x20] sm:$0xff] }
  0x64   : > { %426 = vmatmul.f32.gmra.mxu0 %v350_v55  ;;  %v464_v55 = vld [vmem:[%s2050_s2 + $0x58] sm:$0xff] }
  0x65   : > { %441 = vmatmul.f32.gmra.mxu3 %v355_v56  ;;  %537 = vperm.xlu0 %1295, %v479_v57   ;;  %v458_v56 = vld [vmem:[%s2050_s2 + $0x28] sm:$0xff]  ;;  %v465_v57 = vld [vmem:[%s2050_s2 + $0x60] sm:$0xff] }
  0x66   : > { %542 = vperm.xlu1 %1296, %v480_v58   ;;  %547 = vperm.xlu2 %1297, %v481_v59   ;;  %v459_v58 = vld [vmem:[%s2050_s2 + $0x30] sm:$0xff]  ;;  %v466_v59 = vld [vmem:[%s2050_s2 + $0x68] sm:$0xff] }
  0x6c   : > { %429 = vmatmul.f32.gmra.mxu0 %v351_v60 }
  0x6d   : > { %552 = vperm.xlu0 %1295, %v482_v61  }
  0x6e   : > { %557 = vperm.xlu1 %1296, %v483_v62   ;;  %562 = vperm.xlu2 %1297, %v484_v63  }
  0x74   : > { %432 = vmatmul.f32.gmra.mxu0 %v352_v0 }
  0x90   : > { %v382_v12 = vpop.permute.xlu2 %381 }
  0x98   : > { %v377_v24 = vpop.permute.xlu2 %376 }
  0xa0   : > { %v488_v60 = vpop.permute.xlu2 %487 }
  0xa6   : > { %v402_v4 = vpop.permute.xlu0 %401  ;;  %v392_v7 = vpop.permute.xlu1 %391 }
  0xa8   : > { %v1765_v62 = vpop.permute.xlu2 %502 }
  0xae   : > { %v397_v8 = vpop.permute.xlu0 %396 }
  0xaf   : > { %v387_v17 = vpop.permute.xlu1 %386 }
  0xb0   : > { %v1769_v0 = vpop.permute.xlu2 %517 }
  0xb6   : > { %v372_v29 = vpop.permute.xlu0 %371 }
  0xb7   : > { %v367_v34 = vpop.permute.xlu1 %366 }
  0xbf   : > { %v498_v61 = vpop.permute.xlu1 %497 }
  0xc8   : > { %v1767_v63 = vpop.permute.xlu1 %512 }
  0xd1   : > { %v421_v1 = vpop.f32.mrf.mxu0 }
  0xd2   : > { %v422_v35 = vadd.f32 %v421_v1, %v367_v34  ;;  %v493_v1 = vpop.permute.xlu0 %492 }
  0xd4   : > { %v445_v39 = vmax.f32 %v422_v35, 0.0 }
  0xd8   : > { %v436_v2 = vpop.f32.mrf.mxu3 }
  0xd9   : > { %v424_v3 = vpop.f32.mrf.mxu0  ;;  %v437_v14 = vadd.f32 %v436_v2, %v392_v7  ;;  %v528_v2 = vpop.permute.xlu1 %527 }
  0xda   : > { %v425_v31 = vadd.f32 %v424_v3, %v372_v29  ;;  %v533_v3 = vpop.permute.xlu2 %532 }
  0xdb   : > { %v450_v18 = vmax.f32 %v437_v14, 0.0 }
  0xdc   : > { %v446_v38 = vmax.f32 %v425_v31, 0.0 }
  0xe0   : > { %v439_v5 = vpop.f32.mrf.mxu3 }
  0xe1   : > { %v427_v6 = vpop.f32.mrf.mxu0  ;;  %v440_v10 = vadd.f32 %v439_v5, %v397_v8  ;;  %v1773_v5 = vpop.permute.xlu1 %542 }
  0xe2   : > { %v428_v25 = vadd.f32 %v427_v6, %v377_v24 }
  0xe3   : > { %v451_v16 = vmax.f32 %v440_v10, 0.0 }
  0xe4   : > { %v447_v36 = vmax.f32 %v428_v25, 0.0 }
  0xe8   : > { %v442_v9 = vpop.f32.mrf.mxu3 }
  0xe9   : > { %v443_v11 = vadd.f32 %v442_v9, %v402_v4  ;;  %v430_v13 = vpop.f32.mrf.mxu0  ;;  %v1771_v4 = vpop.permute.xlu0 %507 }
  0xea   : > { %v431_v22 = vadd.f32 %v430_v13, %v382_v12  ;;  %v1775_v9 = vpop.permute.xlu2 %547  ;;  %v558_v12 = vpop.permute.xlu1 %557 }
  0xeb   : > { %v452_v15 = vmax.f32 %v443_v11, 0.0 }
  0xec   : > { %v448_v32 = vmax.f32 %v431_v22, 0.0 }
  0xed   : > { %622 = vmatpush.msra.mxu1 %v452_v15  ;;  %1222 = vmatpush.msra.mxu2 %v452_v15 }
  0xee   : > { %1223 = vmatpush.msrb.mxu3 %v452_v15 }
  0xef   : > { %623 = vmatpush.msra.mxu1 %v451_v16  ;;  %1224 = vmatpush.msra.mxu2 %v451_v16 }
  0xf0   : > { %1225 = vmatpush.msrb.mxu3 %v451_v16 }
  0xf1   : > { %624 = vmatpush.msra.mxu1 %v450_v18  ;;  %1226 = vmatpush.msra.mxu2 %v450_v18  ;;  %v433_v21 = vpop.f32.mrf.mxu0  ;;  %v523_v11 = vpop.permute.xlu0 %522 }
  0xf2   : > { %1227 = vmatpush.msrb.mxu3 %v450_v18  ;;  %v434_v23 = vadd.f32 %v433_v21, %v387_v17  ;;  %v563_v35 = vpop.permute.xlu2 %562 }
  0xf4   : > { %v449_v26 = vmax.f32 %v434_v23, 0.0 }
  0xf6   : > { %625 = vmatpush.msra.mxu1 %v449_v26  ;;  %1228 = vmatpush.msra.mxu2 %v449_v26 }
  0xf7   : > { %1229 = vmatpush.msrb.mxu3 %v449_v26 }
  0xf8   : > { %626 = vmatpush.msra.mxu1 %v448_v32  ;;  %1230 = vmatpush.msra.mxu2 %v448_v32 }
  0xf9   : > { %1231 = vmatpush.msrb.mxu3 %v448_v32 }
  0xfa   : > { %627 = vmatpush.msra.mxu1 %v447_v36  ;;  %1232 = vmatpush.msra.mxu2 %v447_v36 }
  0xfb   : > { %1233 = vmatpush.msrb.mxu3 %v447_v36 }
  0xfc   : > { %628 = vmatpush.msra.mxu1 %v446_v38  ;;  %1234 = vmatpush.msra.mxu2 %v446_v38 }
  0xfd   : > { %1235 = vmatpush.msrb.mxu3 %v446_v38 }
  0xfe   : > { %629 = vmatpush.msra.mxu1 %v445_v39  ;;  %1236 = vmatpush.msra.mxu2 %v445_v39 }
  0xff   : > { %1237 = vmatpush.msrb.mxu3 %v445_v39  ;;  %1185 = vmatmul.msk.f32.vlgmr.msra.gmra.mxu1 %vm565_vm0, %v453_v43 }
 0x100   : > { %1192 = vmatmul.msk.f32.vlgmr.msra.gmra.mxu2 %vm565_vm0, %v460_v45  ;;  %1199 = vmatmul.msk.f32.vlgmr.msrb.gmra.mxu3 %vm565_vm0, %v467_v46 }
 0x107   : > { %1186 = vmatmul.msk.f32.gmra.mxu1 %vm565_vm0, %v454_v47 }
 0x108   : > { %1193 = vmatmul.msk.f32.gmra.mxu2 %vm565_vm0, %v461_v48  ;;  %1200 = vmatmul.msk.f32.gmra.mxu3 %vm565_vm0, %v468_v49 }
 0x10f   : > { %1187 = vmatmul.msk.f32.gmra.mxu1 %vm565_vm0, %v455_v50 }
 0x110   : > { %1194 = vmatmul.msk.f32.gmra.mxu2 %vm565_vm0, %v462_v51 }
 0x117   : > { %1188 = vmatmul.msk.f32.gmra.mxu1 %vm565_vm0, %v456_v52 }
 0x118   : > { %1195 = vmatmul.msk.f32.gmra.mxu2 %vm565_vm0, %v463_v53 }
 0x11f   : > { %1189 = vmatmul.msk.f32.gmra.mxu1 %vm565_vm0, %v457_v54 }
 0x120   : > { %1196 = vmatmul.msk.f32.gmra.mxu2 %vm565_vm0, %v464_v55 }
 0x127   : > { %1190 = vmatmul.msk.f32.gmra.mxu1 %vm565_vm0, %v458_v56 }
 0x128   : > { %1197 = vmatmul.msk.f32.gmra.mxu2 %vm565_vm0, %v465_v57 }
 0x12f   : > { %1191 = vmatmul.msk.f32.gmra.mxu1 %vm565_vm0, %v459_v58 }
 0x130   : > { %1198 = vmatmul.msk.f32.gmra.mxu2 %vm565_vm0, %v466_v59 }
 0x17c   : > { %v631_v6 = vpop.f32.mrf.mxu1 }
 0x17d   : > { %v632_v7 = vadd.f32 %v631_v6, %v488_v60 }
 0x17f   : > { %v679_v8 = vsub.f32 0.0, %v632_v7 }
 0x181   : > { %v695_v10 = vmul.f32 1.442695, %v679_v8 }
 0x183   : > { %1298 = vpow2.f32 %v695_v10  ;;  %v652_v13 = vpop.f32.mrf.mxu2  ;;  %v673_v14 = vpop.f32.mrf.mxu3 }
 0x184   : > { %v653_v15 = vadd.f32 %v652_v13, %v523_v11  ;;  %v674_v16 = vadd.f32 %v673_v14, %v558_v12  ;;  %v634_v17 = vpop.f32.mrf.mxu1 }
 0x185   : > { %v635_v18 = vadd.f32 %v634_v17, %v493_v1 }
 0x186   : > { %v686_v21 = vsub.f32 0.0, %v653_v15  ;;  %v693_v22 = vsub.f32 0.0, %v674_v16 }
 0x187   : > { %v680_v23 = vsub.f32 0.0, %v635_v18 }
 0x188   : > { %v709_v24 = vmul.f32 1.442695, %v686_v21  ;;  %v723_v25 = vmul.f32 1.442695, %v693_v22 }
 0x189   : > { %v1299_v26 = vpop.eup %1298  ;;  %v697_v29 = vmul.f32 1.442695, %v680_v23 }
 0x18a   : > { %v727_v31 = vadd.f32 1.0, %v1299_v26  ;;  %1300 = vpow2.f32 %v709_v24 }
 0x18b   : > { %1302 = vpow2.f32 %v723_v25  ;;  %v655_v32 = vpop.f32.mrf.mxu2  ;;  %v676_v34 = vpop.f32.mrf.mxu3 }
 0x18c   : > { %1304 = vrcp.f32 %v727_v31  ;;  %v637_v36 = vpop.f32.mrf.mxu1  ;;  %v656_v38 = vadd.f32 %v655_v32, %v528_v2  ;;  %v677_v39 = vadd.f32 %v676_v34, %v563_v35  ;;  %vm748_vm1 = vweird.f32 %v727_v31 }
 0x18d   : > { %1306 = vpow2.f32 %v697_v29  ;;  %v638_v43 = vadd.f32 %v637_v36, %v498_v61  ;;  %v752_v57 = vand.u32 2147483647, %v727_v31  ;;  %v754_v58 = vand.u32 2147483648, %v727_v31 }
 0x18e   : > { %v687_v45 = vsub.f32 0.0, %v656_v38  ;;  %v694_v47 = vsub.f32 0.0, %v677_v39 }
 0x18f   : > { %v681_v50 = vsub.f32 0.0, %v638_v43  ;;  %vm1790_vm3 = vcmp.eq.f32.partialorder %v752_v57, 8.507059e+37  ;;  %v755_v14 = vor.u32 1.1754944e-38, %v754_v58 }
 0x190   : > { %v1301_v46 = vpop.eup %1300  ;;  %v711_v53 = vmul.f32 1.442695, %v687_v45  ;;  %v725_v59 = vmul.f32 1.442695, %v694_v47 }
 0x191   : > { %v1303_v48 = vpop.eup %1302  ;;  %v1777_v49 = vadd.f32 1.0, %v1301_v46  ;;  %v699_v1 = vmul.f32 1.442695, %v681_v50 }
 0x192   : > { %v1305_v51 = vpop.eup %1304  ;;  %v1779_v52 = vadd.f32 1.0, %v1303_v48 }
 0x193   : > { %v1307_v54 = vpop.eup %1306  ;;  %v744_v55 = vmul.f32 %v1305_v51, %v727_v31  ;;  %1308 = vrcp.f32 %v1777_v49  ;;  %v658_v56 = vpop.f32.mrf.mxu2  ;;  %vm749_vm2 = vweird.f32 %v1305_v51  ;;  %v850_v2 = vand.u32 2147483647, %v1777_v49 }
 0x194   : > { %1310 = vrcp.f32 %v1779_v52  ;;  %v1783_v61 = vadd.f32 1.0, %v1307_v54  ;;  %v852_v6 = vand.u32 2147483648, %v1777_v49  ;;  %v659_v7 = vadd.f32 %v658_v56, %v533_v3  ;;  %v640_v8 = vpop.f32.mrf.mxu1  ;;  %vm750_vm5 = vmor %vm748_vm1, %vm749_vm2 }
 0x195   : > { %v745_v60 = vsub.f32 1.0, %v744_v55  ;;  %1312 = vpow2.f32 %v711_v53  ;;  %v948_v11 = vand.u32 2147483647, %v1779_v52  ;;  %v950_v12 = vand.u32 2147483648, %v1779_v52 }
 0x196   : > { %1314 = vrcp.f32 %v1783_v61  ;;  %vm846_vm4 = vweird.f32 %v1777_v49  ;;  %v688_v3 = vsub.f32 0.0, %v659_v7  ;;  %v641_v17 = vadd.f32 %v640_v8, %v1765_v62  ;;  %v538_v7 = vpop.permute.xlu0 %537 }
 0x197   : > { %v746_v10 = vmul.f32 %v1305_v51, %v745_v60  ;;  %1316 = vpow2.f32 %v725_v59  ;;  %vm1799_vm6 = vcmp.eq.f32.partialorder %v850_v2, 8.507059e+37  ;;  %v853_v23 = vor.u32 1.1754944e-38, %v852_v6 }
 0x198   : > { %1318 = vpow2.f32 %v699_v1  ;;  %vm944_vm7 = vweird.f32 %v1779_v52  ;;  %vm1805_vm8 = vcmp.eq.f32.partialorder %v948_v11, 8.507059e+37  ;;  %v951_v62 = vor.u32 1.1754944e-38, %v950_v12 }
 0x199   : > { %v1309_v15 = vpop.eup %1308  ;;  %v747_v16 = vadd.f32 %v1305_v51, %v746_v10  ;;  %v713_v29 = vmul.f32 1.442695, %v688_v3  ;;  %v766_v36 = vand.u32 2147483647, %v1783_v61  ;;  %v682_v38 = vsub.f32 0.0, %v641_v17 }
 0x19a   : > { %v1311_v18 = vpop.eup %1310  ;;  %v842_v21 = vmul.f32 %v1309_v15, %v1777_v49  ;;  %vm847_vm9 = vweird.f32 %v1309_v15  ;;  %v768_v55 = vand.u32 2147483648, %v1783_v61  ;;  %vm762_vm11 = vweird.f32 %v1783_v61 }
 0x19b   : > { %v751_v24 = vsel %vm750_vm5, %v1305_v51, %v747_v16  ;;  %v940_v25 = vmul.f32 %v1311_v18, %v1779_v52  ;;  %v661_v31 = vpop.f32.mrf.mxu2  ;;  %v1313_v32 = vpop.eup %1312  ;;  %1320 = vpow2.f32 %v713_v29  ;;  %v701_v51 = vmul.f32 1.442695, %v682_v38  ;;  %vm848_vm12 = vmor %vm846_vm4, %vm847_vm9 }
 0x19c   : > { %v756_v34 = vsel %vm1790_vm3, %v755_v14, %v751_v24  ;;  %v843_v35 = vsub.f32 1.0, %v842_v21  ;;  %v1315_v39 = vpop.eup %1314  ;;  %v1813_v46 = vadd.f32 1.0, %v1313_v32  ;;  %vm945_vm10 = vweird.f32 %v1311_v18  ;;  %v1830_v60 = vpop.f32.mrf.mxu1 }
 0x19d   : > { %v967_v43 = vmul.f32 %v756_v34, %v1635_v44  ;;  %v941_v45 = vsub.f32 1.0, %v940_v25  ;;  %v1317_v47 = vpop.eup %1316  ;;  %v758_v50 = vmul.f32 %v1315_v39, %v1783_v61  ;;  %vm763_vm13 = vweird.f32 %v1315_v39  ;;  %vm946_vm14 = vmor %vm944_vm7, %vm945_vm10 }
 0x19e   : > { %v844_v48 = vmul.f32 %v1309_v15, %v843_v35  ;;  %v1319_v53 = vpop.eup %1318  ;;  %1322 = vrcp.f32 %v1813_v46  ;;  %v1823_v57 = vadd.f32 1.0, %v1317_v47  ;;  %v864_v6 = vand.u32 2147483647, %v1813_v46  ;;  %vm764_vm0 = vmor %vm762_vm11, %vm763_vm13 }
 0x19f   : > { %983 = vst [vmem:[%s1817_s11] sm:$0xff] %v967_v43  ;;  %v942_v54 = vmul.f32 %v1311_v18, %v941_v45  ;;  %v759_v56 = vsub.f32 1.0, %v758_v50  ;;  %v1828_v59 = vadd.f32 1.0, %v1319_v53  ;;  %1324 = vpow2.f32 %v701_v51 }
 0x1a0   : > { %v845_v44 = vadd.f32 %v1309_v15, %v844_v48  ;;  %1326 = vrcp.f32 %v1823_v57  ;;  %vm1838_vm15 = vcmp.eq.f32.partialorder %v766_v36, 8.507059e+37  ;;  %v769_v11 = vor.u32 1.1754944e-38, %v768_v55 }
 0x1a1   : > { %v943_v58 = vadd.f32 %v1311_v18, %v942_v54  ;;  %v760_v2 = vmul.f32 %v1315_v39, %v759_v56  ;;  %v1321_v52 = vpop.eup %1320  ;;  %v662_v16 = vadd.f32 %v661_v31, %v538_v7  ;;  %v962_v21 = vand.u32 2147483647, %v1823_v57 }
 0x1a2   : > { %v849_v1 = vsel %vm848_vm12, %v1309_v15, %v845_v44  ;;  %1328 = vrcp.f32 %v1828_v59  ;;  %vm860_vm1 = vweird.f32 %v1813_v46  ;;  %vm1857_vm2 = vcmp.eq.f32.partialorder %v864_v6, 8.507059e+37 }
 0x1a3   : > { %v854_v49 = vsel %vm1799_vm6, %v853_v23, %v849_v1  ;;  %v947_v8 = vsel %vm946_vm14, %v1311_v18, %v943_v58  ;;  %v1842_v12 = vpop.f32.mrf.mxu2  ;;  %v761_v15 = vadd.f32 %v1315_v39, %v760_v2  ;;  %v866_v18 = vand.u32 2147483648, %v1813_v46 }
 0x1a4   : > { %v974_v13 = vmul.f32 %v854_v49, %v1596_v33  ;;  %v952_v14 = vsel %vm1805_vm8, %v951_v62, %v947_v8  ;;  %v1323_v3 = vpop.eup %1322  ;;  %v964_v24 = vand.u32 2147483648, %v1823_v57  ;;  %v780_v25 = vand.u32 2147483647, %v1828_v59  ;;  %v646_v48 = vpop.f32.mrf.mxu1 }
 0x1a5   : > { %v981_v17 = vmul.f32 %v952_v14, %v1555_v20  ;;  %v765_v33 = vsel %vm764_vm0, %v1315_v39, %v761_v15  ;;  %v856_v22 = vmul.f32 %v1323_v3, %v1813_v46  ;;  %v1325_v20 = vpop.eup %1324  ;;  %v1866_v26 = vadd.f32 1.0, %v1321_v52 }
 0x1a6   : > { %990 = vst [vmem:[%s1817_s11 + $0x38] sm:$0xff] %v974_v13  ;;  %v770_v61 = vsel %vm1838_vm15, %v769_v11, %v765_v33  ;;  %v1327_v62 = vpop.eup %1326  ;;  %v782_v32 = vand.u32 2147483648, %v1828_v59  ;;  %v1870_v34 = vadd.f32 1.0, %v1325_v20  ;;  %v867_v35 = vor.u32 1.1754944e-38, %v866_v18 }
 0x1a7   : > { %997 = vst [vmem:[%s1817_s11 + $0x70] sm:$0xff] %v981_v17  ;;  %v968_v29 = vmul.f32 %v770_v61, %v1627_v42  ;;  %v857_v31 = vsub.f32 1.0, %v856_v22  ;;  %v954_v36 = vmul.f32 %v1327_v62, %v1823_v57  ;;  %vm958_vm3 = vweird.f32 %v1823_v57 }
 0x1a8   : > { %vm1874_vm4 = vcmp.eq.f32.partialorder %v962_v21, 8.507059e+37  ;;  %vm861_vm5 = vweird.f32 %v1323_v3  ;;  %vm776_vm6 = vweird.f32 %v1828_v59  ;;  %1330 = vrcp.f32 %v1866_v26  ;;  %v1329_v43 = vpop.eup %1328 }
 0x1a9   : > { %984 = vst [vmem:[%s1817_s11 + $0x8] sm:$0xff] %v968_v29  ;;  %v858_v39 = vmul.f32 %v1323_v3, %v857_v31  ;;  %v689_v42 = vsub.f32 0.0, %v662_v16  ;;  %v955_v45 = vsub.f32 1.0, %v954_v36  ;;  %vm959_vm7 = vweird.f32 %v1327_v62  ;;  %vm862_vm9 = vmor %vm860_vm1, %vm861_vm5 }
 0x1aa   : > { %v965_v47 = vor.u32 1.1754944e-38, %v964_v24  ;;  %1332 = vrcp.f32 %v1870_v34  ;;  %v772_v51 = vmul.f32 %v1329_v43, %v1828_v59  ;;  %vm1883_vm8 = vcmp.eq.f32.partialorder %v780_v25, 8.507059e+37  ;;  %vm960_vm12 = vmor %vm958_vm3, %vm959_vm7 }
 0x1ab   : > { %v859_v50 = vadd.f32 %v1323_v3, %v858_v39  ;;  %v783_v54 = vor.u32 1.1754944e-38, %v782_v32  ;;  %v667_v55 = vpop.f32.mrf.mxu2  ;;  %v956_v44 = vmul.f32 %v1327_v62, %v955_v45  ;;  %vm777_vm10 = vweird.f32 %v1329_v43 }
 0x1ac   : > { %v878_v56 = vand.u32 2147483647, %v1866_v26  ;;  %v880_v58 = vand.u32 2147483648, %v1866_v26  ;;  %v773_v2 = vsub.f32 1.0, %v772_v51  ;;  %v715_v6 = vmul.f32 1.442695, %v689_v42  ;;  %vm778_vm1 = vmor %vm776_vm6, %vm777_vm10  ;;  %v649_v25 = vpop.f32.mrf.mxu1 }
 0x1ad   : > { %v863_v1 = vsel %vm862_vm9, %v1323_v3, %v859_v50  ;;  %v644_v7 = vadd.f32 %v1830_v60, %v1771_v4  ;;  %v957_v8 = vadd.f32 %v1327_v62, %v956_v44  ;;  %vm874_vm11 = vweird.f32 %v1866_v26 }
 0x1ae   : > { %v868_v49 = vsel %vm1857_vm2, %v867_v35, %v863_v1  ;;  %v794_v46 = vand.u32 2147483647, %v1870_v34  ;;  %v796_v10 = vand.u32 2147483648, %v1870_v34  ;;  %v1331_v11 = vpop.eup %1330  ;;  %v774_v13 = vmul.f32 %v1329_v43, %v773_v2 }
 0x1af   : > { %v975_v52 = vmul.f32 %v868_v49, %v1585_v30  ;;  %vm790_vm13 = vweird.f32 %v1870_v34  ;;  %1334 = vpow2.f32 %v715_v6  ;;  %v683_v4 = vsub.f32 0.0, %v644_v7 }
 0x1b0   : > { %v1333_v60 = vpop.eup %1332  ;;  %v961_v14 = vsel %vm960_vm12, %v1327_v62, %v957_v8  ;;  %v870_v15 = vmul.f32 %v1331_v11, %v1866_v26  ;;  %vm875_vm14 = vweird.f32 %v1331_v11  ;;  %vm1905_vm15 = vcmp.eq.f32.partialorder %v878_v56, 8.507059e+37 }
 0x1b1   : > { %v665_v30 = vadd.f32 %v1842_v12, %v1773_v5  ;;  %991 = vst [vmem:[%s1817_s11 + $0x40] sm:$0xff] %v975_v52  ;;  %v966_v57 = vsel %vm1874_vm4, %v965_v47, %v961_v14  ;;  %v775_v3 = vadd.f32 %v1329_v43, %v774_v13  ;;  %v786_v17 = vmul.f32 %v1333_v60, %v1870_v34  ;;  %vm876_vm2 = vmor %vm874_vm11, %vm875_vm14 }
 0x1b2   : > { %vm791_vm0 = vweird.f32 %v1333_v60  ;;  %v982_v18 = vmul.f32 %v966_v57, %v1552_v19  ;;  %v871_v21 = vsub.f32 1.0, %v870_v15  ;;  %v703_v33 = vmul.f32 1.442695, %v683_v4 }
 0x1b3   : > { %v690_v22 = vsub.f32 0.0, %v665_v30  ;;  %v779_v23 = vsel %vm778_vm1, %v1329_v43, %v775_v3  ;;  %v787_v20 = vsub.f32 1.0, %v786_v17  ;;  %v647_v5 = vadd.f32 %v646_v48, %v1767_v63  ;;  %v670_v35 = vpop.f32.mrf.mxu2  ;;  %vm792_vm3 = vmor %vm790_vm13, %vm791_vm0 }
 0x1b4   : > { %v668_v12 = vadd.f32 %v667_v55, %v1775_v9  ;;  %998 = vst [vmem:[%s1817_s11 + $0x78] sm:$0xff] %v982_v18  ;;  %v784_v61 = vsel %vm1883_vm8, %v783_v54, %v779_v23  ;;  %v872_v24 = vmul.f32 %v1331_v11, %v871_v21  ;;  %1336 = vpow2.f32 %v703_v33  ;;  %v553_v9 = vpop.permute.xlu0 %552 }
 0x1b5   : > { %v717_v19 = vmul.f32 1.442695, %v690_v22  ;;  %v1335_v59 = vpop.eup %1334  ;;  %v969_v62 = vmul.f32 %v784_v61, %v1622_v41  ;;  %v788_v29 = vmul.f32 %v1333_v60, %v787_v20  ;;  %v684_v31 = vsub.f32 0.0, %v647_v5 }
 0x1b6   : > { %v691_v32 = vsub.f32 0.0, %v668_v12  ;;  %v873_v36 = vadd.f32 %v1331_v11, %v872_v24  ;;  %v881_v63 = vor.u32 1.1754944e-38, %v880_v58  ;;  %v737_v38 = vadd.f32 1.0, %v1335_v59 }
 0x1b7   : > { %1338 = vpow2.f32 %v717_v19  ;;  %985 = vst [vmem:[%s1817_s11 + $0x10] sm:$0xff] %v969_v62  ;;  %v789_v39 = vadd.f32 %v1333_v60, %v788_v29  ;;  %v705_v42 = vmul.f32 1.442695, %v684_v31  ;;  %v650_v45 = vadd.f32 %v649_v25, %v1769_v0  ;;  %v1082_v31 = vld [vmem:[%s1817_s11 + $0x38] sm:$0xff] (%p1502_p6) }
 0x1b8   : > { %v719_v43 = vmul.f32 1.442695, %v691_v32  ;;  %v877_v41 = vsel %vm876_vm2, %v1331_v11, %v873_v36  ;;  %v797_v47 = vor.u32 1.1754944e-38, %v796_v10  ;;  %1340 = vrcp.f32 %v737_v38 }
 0x1b9   : > { %v671_v48 = vadd.f32 %v670_v35, %v553_v9  ;;  %v882_v50 = vsel %vm1905_vm15, %v881_v63, %v877_v41  ;;  %v793_v26 = vsel %vm792_vm3, %v1333_v60, %v789_v39  ;;  %vm795_vm4 = vcmp.eq.f32.partialorder %v794_v46, 8.507059e+37 }
 0x1ba   : > { %1342 = vpow2.f32 %v705_v42  ;;  %v1337_v51 = vpop.eup %1336  ;;  %v976_v53 = vmul.f32 %v882_v50, %v1577_v28  ;;  %v798_v0 = vsel %vm795_vm4, %v797_v47, %v793_v26  ;;  %v685_v55 = vsub.f32 0.0, %v650_v45 }
 0x1bb   : > { %1344 = vpow2.f32 %v719_v43  ;;  %v970_v54 = vmul.f32 %v798_v0, %v1617_v40  ;;  %v731_v34 = vadd.f32 1.0, %v1337_v51  ;;  %v692_v56 = vsub.f32 0.0, %v671_v48 }
 0x1bc   : > { %992 = vst [vmem:[%s1817_s11 + $0x48] sm:$0xff] %v976_v53  ;;  %v707_v2 = vmul.f32 1.442695, %v685_v55  ;;  %v892_v28 = vand.u32 2147483647, %v737_v38  ;;  %v894_v46 = vand.u32 2147483648, %v737_v38  ;;  %vm888_vm6 = vweird.f32 %v737_v38 }
 0x1bd   : > { %v1339_v44 = vpop.eup %1338  ;;  %986 = vst [vmem:[%s1817_s11 + $0x18] sm:$0xff] %v970_v54  ;;  %1346 = vrcp.f32 %v731_v34  ;;  %v721_v6 = vmul.f32 1.442695, %v692_v56  ;;  %v808_v52 = vand.u32 2147483647, %v731_v34  ;;  %v810_v60 = vand.u32 2147483648, %v731_v34 }
 0x1be   : > { %v1341_v58 = vpop.eup %1340  ;;  %v1939_v1 = vadd.f32 1.0, %v1339_v44  ;;  %vm893_vm7 = vcmp.eq.f32.partialorder %v892_v28, 8.507059e+37  ;;  %v895_v16 = vor.u32 1.1754944e-38, %v894_v46  ;;  %vm804_vm9 = vweird.f32 %v731_v34 }
 0x1bf   : > { %v884_v49 = vmul.f32 %v1341_v58, %v737_v38  ;;  %vm889_vm5 = vweird.f32 %v1341_v58  ;;  %vm1948_vm10 = vcmp.eq.f32.partialorder %v808_v52, 8.507059e+37  ;;  %v811_v33 = vor.u32 1.1754944e-38, %v810_v60 }
 0x1c0   : > { %v1343_v7 = vpop.eup %1342  ;;  %1348 = vrcp.f32 %v1939_v1  ;;  %vm890_vm8 = vmor %vm888_vm6, %vm889_vm5  ;;  %v906_v17 = vand.u32 2147483647, %v1939_v1  ;;  %v908_v23 = vand.u32 2147483648, %v1939_v1  ;;  %vm902_vm12 = vweird.f32 %v1939_v1 }
 0x1c1   : > { %v1345_v8 = vpop.eup %1344  ;;  %v885_v40 = vsub.f32 1.0, %v884_v49  ;;  %v1942_v10 = vadd.f32 1.0, %v1343_v7  ;;  %1350 = vpow2.f32 %v707_v2 }
 0x1c2   : > { %v1944_v11 = vadd.f32 1.0, %v1345_v8  ;;  %1352 = vpow2.f32 %v721_v6  ;;  %vm1961_vm13 = vcmp.eq.f32.partialorder %v906_v17, 8.507059e+37  ;;  %v1363_v8 = vld [vmem:[%s1549_s10 + $0x28] sm:$0xff] }
 0x1c3   : > { %v1347_v13 = vpop.eup %1346  ;;  %v886_v4 = vmul.f32 %v1341_v58, %v885_v40  ;;  %1354 = vrcp.f32 %v1942_v10  ;;  %v822_v9 = vand.u32 2147483647, %v1942_v10  ;;  %v824_v39 = vand.u32 2147483648, %v1942_v10 }
 0x1c4   : > { %v800_v14 = vmul.f32 %v1347_v13, %v731_v34  ;;  %1356 = vrcp.f32 %v1944_v11  ;;  %vm805_vm11 = vweird.f32 %v1347_v13  ;;  %v922_v48 = vand.u32 2147483648, %v1944_v11 }
 0x1c5   : > { %v887_v15 = vadd.f32 %v1341_v58, %v886_v4  ;;  %vm806_vm14 = vmor %vm804_vm9, %vm805_vm11  ;;  %v920_v51 = vand.u32 2147483647, %v1944_v11  ;;  %vm818_vm3 = vweird.f32 %v1942_v10  ;;  %vm916_vm4 = vweird.f32 %v1944_v11 }
 0x1c6   : > { %v1349_v30 = vpop.eup %1348  ;;  %v801_v57 = vsub.f32 1.0, %v800_v14  ;;  %v825_v55 = vor.u32 1.1754944e-38, %v824_v39  ;;  %vm823_vm6 = vcmp.eq.f32.partialorder %v822_v9, 8.507059e+37  ;;  %v1096_v9 = vld [vmem:[%s1817_s11 + $0x70] sm:$0xff] (%p1502_p6)  ;;  %v1098_v39 = vld [vmem:[%s1817_s11 + $0x78] sm:$0xff] (%p1502_p6) }
 0x1c7   : > { %v1351_v18 = vpop.eup %1350  ;;  %v891_v21 = vsel %vm890_vm8, %v1341_v58, %v887_v15  ;;  %v898_v22 = vmul.f32 %v1349_v30, %v1939_v1  ;;  %vm903_vm15 = vweird.f32 %v1349_v30  ;;  %v923_v1 = vor.u32 1.1754944e-38, %v922_v48 }
 0x1c8   : > { %v1353_v20 = vpop.eup %1352  ;;  %v896_v5 = vsel %vm893_vm7, %v895_v16, %v891_v21  ;;  %v802_v12 = vmul.f32 %v1347_v13, %v801_v57  ;;  %v1955_v61 = vadd.f32 1.0, %v1351_v18  ;;  %vm904_vm0 = vmor %vm902_vm12, %vm903_vm15  ;;  %vm921_vm8 = vcmp.eq.f32.partialorder %v920_v51, 8.507059e+37  ;;  %v1365_v21 = vld [vmem:[%s1549_s10 + $0x30] sm:$0xff] }
 0x1c9   : > { %v1355_v24 = vpop.eup %1354  ;;  %v977_v19 = vmul.f32 %v896_v5, %v1574_v27  ;;  %v899_v25 = vsub.f32 1.0, %v898_v22  ;;  %v1959_v59 = vadd.f32 1.0, %v1353_v20  ;;  %v909_v27 = vor.u32 1.1754944e-38, %v908_v23  ;;  %v1366_v5 = vld [vmem:[%s1549_s10 + $0x68] sm:$0xff] }
 0x1ca   : > { %v1357_v62 = vpop.eup %1356  ;;  %v803_v29 = vadd.f32 %v1347_v13, %v802_v12  ;;  %v814_v32 = vmul.f32 %v1355_v24, %v1942_v10  ;;  %1358 = vrcp.f32 %v1955_v61  ;;  %vm819_vm1 = vweird.f32 %v1355_v24 }
 0x1cb   : > { %993 = vst [vmem:[%s1817_s11 + $0x50] sm:$0xff] %v977_v19  ;;  %v900_v35 = vmul.f32 %v1349_v30, %v899_v25  ;;  %v912_v36 = vmul.f32 %v1357_v62, %v1944_v11  ;;  %1360 = vrcp.f32 %v1959_v59  ;;  %vm917_vm2 = vweird.f32 %v1357_v62  ;;  %vm820_vm5 = vmor %vm818_vm3, %vm819_vm1  ;;  %v1364_v11 = vld [vmem:[%s1549_s10 + $0x60] sm:$0xff]  ;;  %v1072_v19 = vld [vmem:[%s1817_s11 + $0x10] sm:$0xff] (%p1502_p6) }
 0x1cc   : > { %v807_v63 = vsel %vm806_vm14, %v1347_v13, %v803_v29  ;;  %v815_v38 = vsub.f32 1.0, %v814_v32  ;;  %vm918_vm7 = vmor %vm916_vm4, %vm917_vm2  ;;  %v838_v40 = vand.u32 2147483648, %v1955_v61  ;;  %v836_v4 = vand.u32 2147483647, %v1955_v61  ;;  %v1074_v25 = vld [vmem:[%s1817_s11 + $0x18] sm:$0xff] (%p1502_p6)  ;;  %v1084_v32 = vld [vmem:[%s1817_s11 + $0x40] sm:$0xff] (%p1502_p6) }
 0x1cd   : > { %v812_v42 = vsel %vm1948_vm10, %v811_v33, %v807_v63  ;;  %v901_v43 = vadd.f32 %v1349_v30, %v900_v35  ;;  %v913_v45 = vsub.f32 1.0, %v912_v36  ;;  %vm832_vm10 = vweird.f32 %v1955_v61  ;;  %v1086_v35 = vld [vmem:[%s1817_s11 + $0x48] sm:$0xff] (%p1502_p6) }
 0x1ce   : > { %v971_v41 = vmul.f32 %v812_v42, %v1608_v37  ;;  %v816_v47 = vmul.f32 %v1355_v24, %v815_v38  ;;  %v1362_v37 = vld [vmem:[%s1549_s10 + $0x58] sm:$0xff]  ;;  %v936_v15 = vand.u32 2147483648, %v1959_v59  ;;  %v839_v16 = vor.u32 1.1754944e-38, %v838_v40  ;;  %s1203_s10 = sshll.u32 (%p1502_p6), %s1007_s12, 3 }
 0x1cf   : > { %v905_v50 = vsel %vm904_vm0, %v1349_v30, %v901_v43  ;;  %v914_v26 = vmul.f32 %v1357_v62, %v913_v45  ;;  %v934_v57 = vand.u32 2147483647, %v1959_v59  ;;  %vm930_vm14 = vweird.f32 %v1959_v59  ;;  %s1009_s29 = scalar_lea.vmem (%p1502_p6), %s2053_s5, %s1203_s10 }
 0x1d0   : > { %v1359_v53 = vpop.eup %1358  ;;  %987 = vst [vmem:[%s1817_s11 + $0x20] sm:$0xff] %v971_v41  ;;  %v910_v0 = vsel %vm1961_vm13, %v909_v27, %v905_v50  ;;  %v817_v54 = vadd.f32 %v1355_v24, %v816_v47  ;;  %vm837_vm13 = vcmp.eq.f32.partialorder %v836_v4, 8.507059e+37  ;;  %v937_v22 = vor.u32 1.1754944e-38, %v936_v15 }
 0x1d1   : > { %v978_v34 = vmul.f32 %v1362_v37, %v910_v0  ;;  %v915_v44 = vadd.f32 %v1357_v62, %v914_v26  ;;  %v828_v56 = vmul.f32 %v1359_v53, %v1955_v61  ;;  %v1361_v2 = vpop.eup %1360  ;;  %vm833_vm9 = vweird.f32 %v1359_v53  ;;  %v1068_v61 = vld [vmem:[%s1817_s11] sm:$0xff] (%p1502_p6)  ;;  %1073 = vst [vmem:[%s1009_s29 + $0x20] sm:$0xff] (%p1502_p6), %v1072_v19 }
 0x1d2   : > { %v821_v58 = vsel %vm820_vm5, %v1355_v24, %v817_v54  ;;  %v926_v10 = vmul.f32 %v1361_v2, %v1959_v59  ;;  %vm834_vm11 = vmor %vm832_vm10, %vm833_vm9  ;;  %vm931_vm12 = vweird.f32 %v1361_v2  ;;  %vm935_vm0 = vcmp.eq.f32.partialorder %v934_v57, 8.507059e+37  ;;  %v1070_v24 = vld [vmem:[%s1817_s11 + $0x8] sm:$0xff] (%p1502_p6)  ;;  %1069 = vst [vmem:[%s1009_s29] sm:$0xff] (%p1502_p6), %v1068_v61  ;;  %v1088_v27 = vld [vmem:[%s1817_s11 + $0x50] sm:$0xff] (%p1502_p6) }
 0x1d3   : > { %994 = vst [vmem:[%s1817_s11 + $0x58] sm:$0xff] %v978_v34  ;;  %v826_v6 = vsel %vm823_vm6, %v825_v55, %v821_v58  ;;  %v919_v7 = vsel %vm918_vm7, %v1357_v62, %v915_v44  ;;  %v829_v49 = vsub.f32 1.0, %v828_v56  ;;  %vm932_vm15 = vmor %vm930_vm14, %vm931_vm12 }
 0x1d4   : > { %v972_v28 = vmul.f32 %v1363_v8, %v826_v6  ;;  %v924_v46 = vsel %vm921_vm8, %v923_v1, %v919_v7  ;;  %v927_v60 = vsub.f32 1.0, %v926_v10  ;;  %1071 = vst [vmem:[%s1009_s29 + $0x10] sm:$0xff] (%p1502_p6), %v1070_v24 }
 0x1d5   : > { %v979_v52 = vmul.f32 %v1364_v11, %v924_v46  ;;  %v830_v13 = vmul.f32 %v1359_v53, %v829_v49  ;;  %1075 = vst [vmem:[%s1009_s29 + $0x30] sm:$0xff] (%p1502_p6), %v1074_v25 }
 0x1d6   : > { %988 = vst [vmem:[%s1817_s11 + $0x28] sm:$0xff] %v972_v28  ;;  %v928_v30 = vmul.f32 %v1361_v2, %v927_v60 }
 0x1d7   : > { %995 = vst [vmem:[%s1817_s11 + $0x60] sm:$0xff] %v979_v52  ;;  %v831_v14 = vadd.f32 %v1359_v53, %v830_v13  ;;  %v1076_v59 = vld [vmem:[%s1817_s11 + $0x20] sm:$0xff] (%p1502_p6) }
 0x1d8   : > { %v929_v18 = vadd.f32 %v1361_v2, %v928_v30  ;;  %1077 = vst [vmem:[%s1009_s29 + $0x40] sm:$0xff] (%p1502_p6), %v1076_v59 }
 0x1d9   : > { %v835_v3 = vsel %vm834_vm11, %v1359_v53, %v831_v14  ;;  %1083 = vst [vmem:[%s1009_s29 + $0x70] sm:$0xff] (%p1502_p6), %v1082_v31 }
 0x1da   : > { %v840_v17 = vsel %vm837_vm13, %v839_v16, %v835_v3  ;;  %v933_v23 = vsel %vm932_vm15, %v1361_v2, %v929_v18  ;;  %1005 = sbr.rel (!%p1502_p6) target bundleno = 487 (0x1e7), region = 82  ;;  %1085 = vst [vmem:[%s1009_s29 + $0x80] sm:$0xff] (%p1502_p6), %v1084_v32  ;;  %v1090_v36 = vld [vmem:[%s1817_s11 + $0x58] sm:$0xff] (%p1502_p6) }
 0x1db   : > { %v973_v33 = vmul.f32 %v1365_v21, %v840_v17  ;;  %v938_v20 = vsel %vm935_vm0, %v937_v22, %v933_v23  ;;  %1087 = vst [vmem:[%s1009_s29 + $0x90] sm:$0xff] (%p1502_p6), %v1086_v35 }
 0x1dc   : > { %v980_v12 = vmul.f32 %v1366_v5, %v938_v20  ;;  %1089 = vst [vmem:[%s1009_s29 + $0xa0] sm:$0xff] (%p1502_p6), %v1088_v27 }
 0x1dd   : > { %989 = vst [vmem:[%s1817_s11 + $0x30] sm:$0xff] %v973_v33  ;;  %v1078_v62 = vld [vmem:[%s1817_s11 + $0x28] sm:$0xff] (%p1502_p6) }
 0x1de   : > { %996 = vst [vmem:[%s1817_s11 + $0x68] sm:$0xff] %v980_v12  ;;  %v1092_v63 = vld [vmem:[%s1817_s11 + $0x60] sm:$0xff] (%p1502_p6) }
 0x1df   : > { %1079 = vst [vmem:[%s1009_s29 + $0x50] sm:$0xff] %v1078_v62 }
 0x1e0   : > { %1091 = vst [vmem:[%s1009_s29 + $0xb0] sm:$0xff] %v1090_v36 }
 0x1e1   : > { %1093 = vst [vmem:[%s1009_s29 + $0xc0] sm:$0xff] %v1092_v63 }
 0x1e2   : > { %1097 = vst [vmem:[%s1009_s29 + $0xe0] sm:$0xff] %v1096_v9 }
 0x1e3   : > { %1099 = vst [vmem:[%s1009_s29 + $0xf0] sm:$0xff] %v1098_v39 }
 0x1e4   : > { %v1080_v29 = vld [vmem:[%s1817_s11 + $0x30] sm:$0xff] }
 0x1e5   : > { %1081 = vst [vmem:[%s1009_s29 + $0x60] sm:$0xff] %v1080_v29  ;;  %v1094_v38 = vld [vmem:[%s1817_s11 + $0x68] sm:$0xff] }
 0x1e6   : > { %1095 = vst [vmem:[%s1009_s29 + $0xd0] sm:$0xff] %v1094_v38 }
 0x1e7 PF: > { %s15_s24 = sadd.s32 1, %s1421_s24   ;;  %s2075_s18 = smov %s1401_s19 }
 0x1e8   : > { %p12_p12 = scmp.ge.s32.totalorder %s15_s24, 6   ;;  %s2076_s19 = smov %s1510_s8 }
 0x1e9   : > { %s2077_s20 = smov %s1413_s22  ;;  %s2078_s21 = smov %s1417_s23 }
 0x1ea   : > { %s2079_s22 = smov %s2082_s25  ;;  %s2080_s23 = smov %s2086_s26 }
 0x1eb   :  { %14 = sbr.rel (!%p12_p12) target bundleno = 4 (0x4), region = 151 }

</bundles_post_ra>
